<compile_context>
chip_gen: v7x
topology: tpu7x:2x2x1
jax: 0.10.0
libtpu: 0.0.40
codegen_flags: <defaults>
</compile_context>

<pallas_src>
import functools
import math

import numpy as np
import jax
import jax.numpy as jnp
from jax.experimental import pallas as pl
from jax.experimental.pallas import tpu as pltpu

VMEM = pltpu.MemorySpace.VMEM
KSZ = 5  # Conv1d kernel size


# ---------------------------------------------------------------------------
# Single fused kernel for the whole forward pass.
# ---------------------------------------------------------------------------
def arc_fused_kernel(x_ref, w1_ref, b1_ref, w2_ref, b2_ref,
                     wbig_ref, bbig_ref, wblk_ref,
                     wfc1_ref, bfc1_ref, wfc2_ref, bfc2_ref,
                     s1_ref, s2_ref, enc_sel_ref, hq_sel_ref,
                     seg_ref, seg_t_ref, sum_sel_ref,
                     res_ref, attn_ref,
                     pad1_ref, pad2_ref):
    f32 = jnp.float32
    B, L, Cin = x_ref.shape          # (2, 16, 128)
    C1 = w1_ref.shape[1]             # 64
    C2 = w2_ref.shape[1]             # 32
    L1 = L // 2                      # 8
    T = L1 // 2                      # 4
    H = wblk_ref.shape[0] // 2       # 16
    P1 = L + 4                       # padded rows per batch, conv1
    P2 = L1 + 4                      # padded rows per batch, conv2

    # ---------------- conv1 -> ReLU -> MaxPool (batched im2col) --------------
    # pad1 layout: flat (B*P1, Cin); batch b data in rows [b*P1+2, b*P1+2+L)
    # with 2-row zero margins.  Only the margins are zeroed (data rows are
    # fully overwritten).
    for b in range(B):
        pad1_ref[b * P1:b * P1 + 2, :] = jnp.zeros((2, Cin), f32)
        pad1_ref[b * P1 + 2 + L:(b + 1) * P1, :] = jnp.zeros((2, Cin), f32)
        pad1_ref[b * P1 + 2:b * P1 + 2 + L, :] = x_ref[b]

    # ONE tap-slab + ONE conv matmul for the whole batch.  Slab row j = b*P1+l
    # is the valid output (b, l); the 4 rows between batches are junk and are
    # dropped by the pool selector below.
    R1 = B * P1 - 4
    slab1 = jnp.concatenate([pad1_ref[k:k + R1, :] for k in range(KSZ)], axis=1)
    acc1 = jnp.dot(slab1, w1_ref[...], preferred_element_type=f32)      # (R1, C1)

    # Stacked even/odd selector: ONE matmul, then max of the two row halves.
    r1 = jnp.dot(s1_ref[...], acc1, preferred_element_type=f32)         # (2*B*L1, C1)
    # bias + ReLU after the pool max is exact: bias is a per-channel constant
    # and ReLU is monotone, so max / +bias / ReLU commute.  Do not reorder.
    pooled1 = jnp.maximum(
        jnp.maximum(r1[0:B * L1, :], r1[B * L1:2 * B * L1, :]) + b1_ref[...],
        0.0)                                                            # (B*L1, C1)

    # ---------------- conv2 -> ReLU -> MaxPool (same scheme) -----------------
    for b in range(B):
        pad2_ref[b * P2:b * P2 + 2, :] = jnp.zeros((2, C1), f32)
        pad2_ref[b * P2 + 2 + L1:(b + 1) * P2, :] = jnp.zeros((2, C1), f32)
        pad2_ref[b * P2 + 2:b * P2 + 2 + L1, :] = pooled1[b * L1:(b + 1) * L1, :]

    R2 = B * P2 - 4
    slab2 = jnp.concatenate([pad2_ref[k:k + R2, :] for k in range(KSZ)], axis=1)
    acc2 = jnp.dot(slab2, w2_ref[...], preferred_element_type=f32)      # (R2, C2)

    # s2 stacks [even fwd-time | even rev-time | odd fwd | odd rev] rows in
    # time-major (t*B + b) order, so ONE matmul + max produces both the LSTM
    # input sequence AND its time-reversed copy (for the backward direction)
    # with no x2 VMEM scratch round trip.
    r2 = jnp.dot(s2_ref[...], acc2, preferred_element_type=f32)         # (4*B*T, C2)
    x2r = jnp.maximum(
        jnp.maximum(r2[0:2 * B * T, :], r2[2 * B * T:4 * B * T, :]) + b2_ref[...],
        0.0)                                                            # (2*B*T, C2)

    # ---------------- BiLSTM: both directions fused in ONE recurrence --------
    # X_big row t*B+b = [x2(b, t) | x2(b, T-1-t)]; ONE input-projection matmul
    # for all timesteps / both directions, hoisted off the serial chain.
    x_big = jnp.concatenate([x2r[0:B * T, :], x2r[B * T:2 * B * T, :]], axis=1)
    xp_all = (jnp.dot(x_big, wbig_ref[...], preferred_element_type=f32)
              + bbig_ref[...])                                          # (B*T, 8H)

    # Fused state layout [h_fwd | h_bwd]; gate columns are interleaved
    # [i_f i_b | f_f f_b | g_f g_b | o_f o_b] so each gate is one contiguous
    # 2H lane block matching the state layout.
    h = jnp.zeros((B, 2 * H), f32)
    c = jnp.zeros((B, 2 * H), f32)
    hs = []
    for s in range(T):  # serial chain halved: fwd handles t=s, bwd handles t=T-1-s
        g = xp_all[s * B:(s + 1) * B, :] + jnp.dot(
            h, wblk_ref[...], preferred_element_type=f32)               # (B, 8H)
        sg = jax.nn.sigmoid(g)           # full-width EUP pass
        th = jnp.tanh(g)                 # full-width EUP pass
        i_g = sg[:, 0:2 * H]
        f_g = sg[:, 2 * H:4 * H]
        g_g = th[:, 4 * H:6 * H]
        o_g = sg[:, 6 * H:8 * H]
        c = f_g * c + i_g * g_g
        h = o_g * jnp.tanh(c)
        hs.append(h)
    # hs[s][:, :H] = h_fwd(t=s), hs[s][:, H:] = h_bwd(t=T-1-s); h = last step
    # (= hn[-2] in lanes [0:H] and hn[-1] in lanes [H:2H]).

    # ---------------- attention (selector matmuls on the idle MXU) -----------
    hs_cat = jnp.concatenate(hs, axis=1)                                # (B, 2*T*H)
    enc_wide = jnp.dot(hs_cat, enc_sel_ref[...],
                       preferred_element_type=f32)                      # (B, T*H)
    hq_wide = jnp.dot(h, hq_sel_ref[...], preferred_element_type=f32)   # (B, T*H)
    scores = jnp.dot(enc_wide * hq_wide, seg_ref[...],
                     preferred_element_type=f32)                        # (B, T)
    scores = scores - jnp.max(scores, axis=1, keepdims=True)
    e = jnp.exp(scores)
    soft = e * pl.reciprocal(jnp.sum(e, axis=1, keepdims=True), approx=True)
    attn_ref[...] = soft
    soft_wide = jnp.dot(soft, seg_t_ref[...], preferred_element_type=f32)
    new_h = jnp.tanh(jnp.dot(enc_wide * soft_wide, sum_sel_ref[...],
                             preferred_element_type=f32))               # (B, H)

    # ---------------- prediction head ----------------------------------------
    hid = jnp.dot(new_h, wfc1_ref[...], preferred_element_type=f32) + bfc1_ref[...]
    # TODO(synk): nn.Dropout(0.2) is treated as inference-mode identity (no RNG mask).
    logit = jnp.dot(hid, wfc2_ref[...], preferred_element_type=f32) + bfc2_ref[...]
    res_ref[...] = jax.nn.sigmoid(logit)


# ---------------------------------------------------------------------------
# Trace-time 0/1 selector constants (pooling, junk-row drop, time reversal,
# attention segment sums).  Built with numpy once; passed as kernel inputs.
# ---------------------------------------------------------------------------
@functools.lru_cache(maxsize=None)
def _selectors(B, L, H):
    L1, T = L // 2, L // 4
    P1, P2 = L + 4, L // 2 + 4

    s1 = np.zeros((2 * B * L1, B * P1 - 4), np.float32)
    for b in range(B):
        for m in range(L1):
            s1[b * L1 + m, b * P1 + 2 * m] = 1.0               # even taps
            s1[B * L1 + b * L1 + m, b * P1 + 2 * m + 1] = 1.0  # odd taps

    s2 = np.zeros((4 * B * T, B * P2 - 4), np.float32)
    for t in range(T):
        for b in range(B):
            r = t * B + b                                       # time-major rows
            s2[r, b * P2 + 2 * t] = 1.0                         # even, forward time
            s2[B * T + r, b * P2 + 2 * (T - 1 - t)] = 1.0       # even, reversed time
            s2[2 * B * T + r, b * P2 + 2 * t + 1] = 1.0         # odd, forward
            s2[3 * B * T + r, b * P2 + 2 * (T - 1 - t) + 1] = 1.0  # odd, reversed

    enc_sel = np.zeros((2 * T * H, T * H), np.float32)
    hq_sel = np.zeros((2 * H, T * H), np.float32)
    seg = np.zeros((T * H, T), np.float32)
    sum_sel = np.zeros((T * H, H), np.float32)
    for t in range(T):
        seg[t * H:(t + 1) * H, t] = 1.0
        for j in range(H):
            enc_sel[t * 2 * H + j, t * H + j] = 1.0                  # fwd slot t -> time t
            enc_sel[t * 2 * H + H + j, (T - 1 - t) * H + j] = 1.0    # bwd slot t -> time T-1-t
            hq_sel[j, t * H + j] = 1.0
            hq_sel[H + j, t * H + j] = 1.0
            sum_sel[t * H + j, j] = 1.0
    return s1, s2, enc_sel, hq_sel, seg, seg.T.copy(), sum_sel


# ---------------------------------------------------------------------------
# Wrapper: single gridless pallas_call, whole arrays in VMEM (KB-scale).
# ---------------------------------------------------------------------------
@jax.jit
def arc_forward(x_ncl, p):
    x = jnp.transpose(x_ncl, (0, 2, 1)).astype(jnp.float32)  # (B, L, 128) channels-last
    B, L, Cin = x.shape
    C1 = p["b_cnn"].shape[1]                                  # 64
    T = L // 4
    H = p["w_blk"].shape[0] // 2
    sels = _selectors(B, L, H)
    # TODO(synk): for real batched serving (B > 2) add a batch grid with
    # compiler_params=pltpu.CompilerParams(dimension_semantics=("parallel",))
    # so the second v7x TensorCore processes half the samples.
    return pl.pallas_call(
        arc_fused_kernel,
        out_shape=(jax.ShapeDtypeStruct((B, 1), jnp.float32),
                   jax.ShapeDtypeStruct((B, T), jnp.float32)),
        in_specs=[pl.BlockSpec(memory_space=VMEM)] * 19,
        out_specs=(pl.BlockSpec(memory_space=VMEM),
                   pl.BlockSpec(memory_space=VMEM)),
        scratch_shapes=[
            pltpu.VMEM((B * (L + 4), Cin), jnp.float32),       # padded conv1 input
            pltpu.VMEM((B * (L // 2 + 4), C1), jnp.float32),   # padded conv2 input
        ],
    )(x, p["w_cnn"], p["b_cnn"], p["w_cnn2"], p["b_cnn2"],
      p["w_big"], p["b_big"], p["w_blk"],
      p["w_fc1"], p["b_fc1"], p["w_fc2"], p["b_fc2"],
      *sels)


# ---------------------------------------------------------------------------
# Parameters (deterministic, PyTorch-default-style uniform init).  The fused
# BiLSTM layouts used by the kernel are built ONCE here, outside the hot path;
# the plain per-direction weights are kept for the pure-JAX reference.
# ---------------------------------------------------------------------------
def init_params(key):
    ks = jax.random.split(key, 16)

    def u(k, shape, fan_in):
        bnd = 1.0 / math.sqrt(fan_in)
        return jax.random.uniform(k, shape, jnp.float32, -bnd, bnd)

    H = 16
    C2 = 32
    p = {}
    # self.cnn: Conv1d(128 -> 64, k=5, pad=2); weight flattened for im2col:
    # (Cout, Cin, K) -> (K, Cin, Cout) -> (K*Cin, Cout)
    w = u(ks[0], (64, 128, 5), 128 * 5)
    p["w_cnn"] = jnp.transpose(w, (2, 1, 0)).reshape(5 * 128, 64)
    p["b_cnn"] = u(ks[1], (1, 64), 128 * 5)
    # self.cnn2: Conv1d(64 -> 32, k=5, pad=2)
    w = u(ks[2], (32, 64, 5), 64 * 5)
    p["w_cnn2"] = jnp.transpose(w, (2, 1, 0)).reshape(5 * 64, 32)
    p["b_cnn2"] = u(ks[3], (1, 32), 64 * 5)

    # BiLSTM(32 -> 16, bidirectional); per-direction weights in (in, 4H) /
    # (H, 4H) layout, PyTorch gate order i|f|g|o along columns.
    def lstm_dir(kw, kr, kbi, kbh, in_dim):
        wih = u(kw, (4 * H, in_dim), H)     # PyTorch weight_ih_l0 layout
        whh = u(kr, (4 * H, H), H)
        bih = u(kbi, (4 * H,), H)
        bhh = u(kbh, (4 * H,), H)
        return (jnp.transpose(wih), jnp.transpose(whh),
                (bih + bhh).reshape(1, 4 * H))

    p["wih_f"], p["whh_f"], p["b_f"] = lstm_dir(ks[4], ks[5], ks[6], ks[7], C2)
    p["wih_b"], p["whh_b"], p["b_b"] = lstm_dir(ks[8], ks[9], ks[10], ks[11], C2)

    # Fused kernel layouts.  Gate columns: [i_f i_b | f_f f_b | g_f g_b | o_f o_b].
    #   w_big (2*C2, 8H): rows [0:C2] feed the fwd columns from x_t,
    #                     rows [C2:2*C2] feed the bwd columns from x_{T-1-t}.
    #   w_blk (2H, 8H):   block-diagonal recurrent weight for [h_fwd | h_bwd].
    w_big = jnp.zeros((2 * C2, 8 * H), jnp.float32)
    b_big = jnp.zeros((1, 8 * H), jnp.float32)
    w_blk = jnp.zeros((2 * H, 8 * H), jnp.float32)
    for gi in range(4):
        src = slice(gi * H, (gi + 1) * H)
        fdst = slice(2 * gi * H, 2 * gi * H + H)
        bdst = slice(2 * gi * H + H, 2 * (gi + 1) * H)
        w_big = w_big.at[0:C2, fdst].set(p["wih_f"][:, src])
        w_big = w_big.at[C2:2 * C2, bdst].set(p["wih_b"][:, src])
        b_big = b_big.at[:, fdst].set(p["b_f"][:, src])
        b_big = b_big.at[:, bdst].set(p["b_b"][:, src])
        w_blk = w_blk.at[0:H, fdst].set(p["whh_f"][:, src])
        w_blk = w_blk.at[H:2 * H, bdst].set(p["whh_b"][:, src])
    p["w_big"], p["b_big"], p["w_blk"] = w_big, b_big, w_blk

    # Prediction: Linear(16, 8) -> Dropout -> Linear(8, 1) -> Sigmoid
    p["w_fc1"] = jnp.transpose(u(ks[12], (8, 16), 16))   # (16, 8)
    p["b_fc1"] = u(ks[13], (1, 8), 16)
    p["w_fc2"] = jnp.transpose(u(ks[14], (1, 8), 8))     # (8, 1)
    p["b_fc2"] = u(ks[15], (1, 1), 8)
    return p
    # NOTE: self.embedding in the PyTorch module is unused in forward -> omitted.


# ---------------------------------------------------------------------------
# Pure-JAX reference (plain XLA, un-fused weights) used for a tolerance check.
# ---------------------------------------------------------------------------
def ref_forward(x_ncl, p):
    x = jnp.transpose(x_ncl, (0, 2, 1)).astype(jnp.float32)
    H = 16

    def conv_relu_pool(h, w_flat, b):
        B, L, _ = h.shape
        hp = jnp.pad(h, ((0, 0), (2, 2), (0, 0)))
        slab = jnp.concatenate([hp[:, k:k + L, :] for k in range(5)], axis=-1)
        y = jnp.maximum(jnp.einsum("blk,kc->blc", slab, w_flat) + b, 0.0)
        return jnp.maximum(y[:, 0::2, :], y[:, 1::2, :])

    h1 = conv_relu_pool(x, p["w_cnn"], p["b_cnn"])
    h2 = conv_relu_pool(h1, p["w_cnn2"], p["b_cnn2"])
    B = h2.shape[0]

    def run_dir(wih, whh, bias, reverse):
        def step(carry, xt):
            h, c = carry
            g = xt @ wih + h @ whh + bias
            i = jax.nn.sigmoid(g[:, :H]); f = jax.nn.sigmoid(g[:, H:2 * H])
            gg = jnp.tanh(g[:, 2 * H:3 * H]); o = jax.nn.sigmoid(g[:, 3 * H:])
            c = f * c + i * gg
            h = o * jnp.tanh(c)
            return (h, c), h
        xs = jnp.transpose(h2, (1, 0, 2))
        (hf, _), hs = jax.lax.scan(
            step, (jnp.zeros((B, H)), jnp.zeros((B, H))), xs, reverse=reverse)
        return hs, hf

    hs_f, hfin_f = run_dir(p["wih_f"], p["whh_f"], p["b_f"], False)
    hs_b, hfin_b = run_dir(p["wih_b"], p["whh_b"], p["b_b"], True)
    enc = jnp.transpose(hs_f + hs_b, (1, 0, 2))
    hq = hfin_f + hfin_b
    scores = jnp.einsum("bth,bh->bt", enc, hq)
    soft = jax.nn.softmax(scores, axis=1)
    new_h = jnp.tanh(jnp.einsum("bt,bth->bh", soft, enc))
    hid = new_h @ p["w_fc1"] + p["b_fc1"]
    out = jax.nn.sigmoid(hid @ p["w_fc2"] + p["b_fc2"])
    return out, soft


if __name__ == "__main__":
    key = jax.random.PRNGKey(0)
    kx, kp = jax.random.split(key)
    B, C, L = 2, 128, 16
    x = jax.random.normal(kx, (B, C, L), jnp.float32)
    params = init_params(kp)

    res, attn = arc_forward(x, params)
    jax.block_until_ready((res, attn))

    assert res.shape == (B, 1), res.shape
    assert attn.shape == (B, L // 4), attn.shape
    assert jnp.all(jnp.isfinite(res)) and jnp.all(jnp.isfinite(attn))

    res_ref, attn_ref = ref_forward(x, params)
    # Tolerance tightened 50x vs the previous 5e-2 so layout/indexing bugs
    # aren't masked; the remaining bound is the EUP approximate reciprocal
    # (pl.reciprocal(approx=True), ~2^-12 relative) used for the softmax denom.
    assert jnp.allclose(res, res_ref, atol=1e-3, rtol=1e-3), (res, res_ref)
    assert jnp.allclose(attn, attn_ref, atol=1e-3, rtol=1e-3), (attn, attn_ref)
    print("KERNEL_OK")
</pallas_src>

<mosaic_0001>
module attributes {stable_mosaic.version = 11 : i64} {
  func.func @arc_fused_kernel(%arg0: memref<2x16x128xf32, #tpu.memory_space<vmem>>, %arg1: memref<640x64xf32, #tpu.memory_space<vmem>>, %arg2: memref<1x64xf32, #tpu.memory_space<vmem>>, %arg3: memref<320x32xf32, #tpu.memory_space<vmem>>, %arg4: memref<1x32xf32, #tpu.memory_space<vmem>>, %arg5: memref<64x128xf32, #tpu.memory_space<vmem>>, %arg6: memref<1x128xf32, #tpu.memory_space<vmem>>, %arg7: memref<32x128xf32, #tpu.memory_space<vmem>>, %arg8: memref<16x8xf32, #tpu.memory_space<vmem>>, %arg9: memref<1x8xf32, #tpu.memory_space<vmem>>, %arg10: memref<8x1xf32, #tpu.memory_space<vmem>>, %arg11: memref<1x1xf32, #tpu.memory_space<vmem>>, %arg12: memref<32x36xf32, #tpu.memory_space<vmem>>, %arg13: memref<32x20xf32, #tpu.memory_space<vmem>>, %arg14: memref<128x64xf32, #tpu.memory_space<vmem>>, %arg15: memref<32x64xf32, #tpu.memory_space<vmem>>, %arg16: memref<64x4xf32, #tpu.memory_space<vmem>>, %arg17: memref<4x64xf32, #tpu.memory_space<vmem>>, %arg18: memref<64x16xf32, #tpu.memory_space<vmem>>, %arg19: memref<2x1xf32, #tpu.memory_space<vmem>>, %arg20: memref<2x4xf32, #tpu.memory_space<vmem>>, %arg21: memref<40x128xf32, #tpu.memory_space<vmem>>, %arg22: memref<24x64xf32, #tpu.memory_space<vmem>>) attributes {dimension_semantics = [], scalar_prefetch = 0 : i64, scratch_operands = 2 : i64, tpu.core_type = #tpu.core_type<tc>} {
    %cst = arith.constant 0.000000e+00 : f32
    %0 = vector.broadcast %cst : f32 to vector<2x128xf32>
    %c0 = arith.constant 0 : index
    %c0_0 = arith.constant 0 : index
    %1 = vector.load %arg21[%c0, %c0_0] : memref<40x128xf32, #tpu.memory_space<vmem>>, vector<2x128xf32>
    tpu.vector_store %arg21[%c0, %c0_0], %0 {strides = array<i32>} : memref<40x128xf32, #tpu.memory_space<vmem>>, vector<2x128xf32>,
    %cst_1 = arith.constant 0.000000e+00 : f32
    %2 = vector.broadcast %cst_1 : f32 to vector<2x128xf32>
    %c18 = arith.constant 18 : index
    %c0_2 = arith.constant 0 : index
    %3 = vector.load %arg21[%c18, %c0_2] : memref<40x128xf32, #tpu.memory_space<vmem>>, vector<2x128xf32>
    tpu.vector_store %arg21[%c18, %c0_2], %2 {strides = array<i32>} : memref<40x128xf32, #tpu.memory_space<vmem>>, vector<2x128xf32>,
    %c0_3 = arith.constant 0 : index
    %c0_4 = arith.constant 0 : index
    %c0_5 = arith.constant 0 : index
    %4 = vector.load %arg0[%c0_3, %c0_4, %c0_5] : memref<2x16x128xf32, #tpu.memory_space<vmem>>, vector<1x16x128xf32>
    %5 = vector.shape_cast %4 : vector<1x16x128xf32> to vector<16x128xf32>
    %c2 = arith.constant 2 : index
    %c0_6 = arith.constant 0 : index
    %6 = vector.load %arg21[%c2, %c0_6] : memref<40x128xf32, #tpu.memory_space<vmem>>, vector<16x128xf32>
    tpu.vector_store %arg21[%c2, %c0_6], %5 {strides = array<i32>} : memref<40x128xf32, #tpu.memory_space<vmem>>, vector<16x128xf32>,
    %cst_7 = arith.constant 0.000000e+00 : f32
    %7 = vector.broadcast %cst_7 : f32 to vector<2x128xf32>
    %c20 = arith.constant 20 : index
    %c0_8 = arith.constant 0 : index
    %8 = vector.load %arg21[%c20, %c0_8] : memref<40x128xf32, #tpu.memory_space<vmem>>, vector<2x128xf32>
    tpu.vector_store %arg21[%c20, %c0_8], %7 {strides = array<i32>} : memref<40x128xf32, #tpu.memory_space<vmem>>, vector<2x128xf32>,
    %cst_9 = arith.constant 0.000000e+00 : f32
    %9 = vector.broadcast %cst_9 : f32 to vector<2x128xf32>
    %c38 = arith.constant 38 : index
    %c0_10 = arith.constant 0 : index
    %10 = vector.load %arg21[%c38, %c0_10] : memref<40x128xf32, #tpu.memory_space<vmem>>, vector<2x128xf32>
    tpu.vector_store %arg21[%c38, %c0_10], %9 {strides = array<i32>} : memref<40x128xf32, #tpu.memory_space<vmem>>, vector<2x128xf32>,
    %c1 = arith.constant 1 : index
    %c0_11 = arith.constant 0 : index
    %c0_12 = arith.constant 0 : index
    %11 = vector.load %arg0[%c1, %c0_11, %c0_12] : memref<2x16x128xf32, #tpu.memory_space<vmem>>, vector<1x16x128xf32>
    %12 = vector.shape_cast %11 : vector<1x16x128xf32> to vector<16x128xf32>
    %c22 = arith.constant 22 : index
    %c0_13 = arith.constant 0 : index
    %13 = vector.load %arg21[%c22, %c0_13] : memref<40x128xf32, #tpu.memory_space<vmem>>, vector<16x128xf32>
    tpu.vector_store %arg21[%c22, %c0_13], %12 {strides = array<i32>} : memref<40x128xf32, #tpu.memory_space<vmem>>, vector<16x128xf32>,
    %c0_14 = arith.constant 0 : index
    %c0_15 = arith.constant 0 : index
    %14 = vector.load %arg21[%c0_14, %c0_15] : memref<40x128xf32, #tpu.memory_space<vmem>>, vector<36x128xf32>
    %c1_16 = arith.constant 1 : index
    %c0_17 = arith.constant 0 : index
    %15 = vector.load %arg21[%c1_16, %c0_17] : memref<40x128xf32, #tpu.memory_space<vmem>>, vector<36x128xf32>
    %c2_18 = arith.constant 2 : index
    %c0_19 = arith.constant 0 : index
    %16 = vector.load %arg21[%c2_18, %c0_19] : memref<40x128xf32, #tpu.memory_space<vmem>>, vector<36x128xf32>
    %c3 = arith.constant 3 : index
    %c0_20 = arith.constant 0 : index
    %17 = vector.load %arg21[%c3, %c0_20] : memref<40x128xf32, #tpu.memory_space<vmem>>, vector<36x128xf32>
    %c4 = arith.constant 4 : index
    %c0_21 = arith.constant 0 : index
    %18 = vector.load %arg21[%c4, %c0_21] : memref<40x128xf32, #tpu.memory_space<vmem>>, vector<36x128xf32>
    %19 = tpu.concatenate %14, %15, %16, %17, %18 in 1 : vector<36x128xf32>, vector<36x128xf32>, vector<36x128xf32>, vector<36x128xf32>, vector<36x128xf32> -> vector<36x640xf32>
    %c0_22 = arith.constant 0 : index
    %c0_23 = arith.constant 0 : index
    %20 = vector.load %arg1[%c0_22, %c0_23] : memref<640x64xf32, #tpu.memory_space<vmem>>, vector<640x64xf32>
    %cst_24 = arith.constant dense<0.000000e+00> : vector<36x64xf32>
    %21 = tpu.matmul %19, %20, %cst_24 {dimension_numbers = #tpu.dot_dimension_numbers<[1], [0], [0], [1], [0, 0, 1, 1], [], []>} : vector<36x640xf32>, vector<640x64xf32>, vector<36x64xf32> -> vector<36x64xf32>
    %c0_25 = arith.constant 0 : index
    %c0_26 = arith.constant 0 : index
    %22 = vector.load %arg12[%c0_25, %c0_26] : memref<32x36xf32, #tpu.memory_space<vmem>>, vector<32x36xf32>
    %cst_27 = arith.constant dense<0.000000e+00> : vector<32x64xf32>
    %23 = tpu.matmul %22, %21, %cst_27 {dimension_numbers = #tpu.dot_dimension_numbers<[1], [0], [0], [1], [0, 0, 1, 1], [], []>} : vector<32x36xf32>, vector<36x64xf32>, vector<32x64xf32> -> vector<32x64xf32>
    %24 = vector.extract_strided_slice %23 {offsets = [0, 0], sizes = [16, 64], strides = [1, 1]} : vector<32x64xf32> to vector<16x64xf32>
    %25 = vector.extract_strided_slice %23 {offsets = [16, 0], sizes = [16, 64], strides = [1, 1]} : vector<32x64xf32> to vector<16x64xf32>
    %26 = arith.maximumf %24, %25 : vector<16x64xf32>
    %c0_28 = arith.constant 0 : index
    %c0_29 = arith.constant 0 : index
    %27 = vector.load %arg2[%c0_28, %c0_29] : memref<1x64xf32, #tpu.memory_space<vmem>>, vector<1x64xf32>
    %28 = vector.broadcast %27 : vector<1x64xf32> to vector<16x64xf32>
    %29 = arith.addf %26, %28 : vector<16x64xf32>
    %cst_30 = arith.constant 0.000000e+00 : f32
    %30 = vector.broadcast %cst_30 : f32 to vector<16x64xf32>
    %31 = arith.maximumf %29, %30 : vector<16x64xf32>
    %cst_31 = arith.constant 0.000000e+00 : f32
    %32 = vector.broadcast %cst_31 : f32 to vector<2x64xf32>
    %c0_32 = arith.constant 0 : index
    %c0_33 = arith.constant 0 : index
    %33 = vector.load %arg22[%c0_32, %c0_33] : memref<24x64xf32, #tpu.memory_space<vmem>>, vector<2x64xf32>
    tpu.vector_store %arg22[%c0_32, %c0_33], %32 {strides = array<i32>} : memref<24x64xf32, #tpu.memory_space<vmem>>, vector<2x64xf32>,
    %cst_34 = arith.constant 0.000000e+00 : f32
    %34 = vector.broadcast %cst_34 : f32 to vector<2x64xf32>
    %c10 = arith.constant 10 : index
    %c0_35 = arith.constant 0 : index
    %35 = vector.load %arg22[%c10, %c0_35] : memref<24x64xf32, #tpu.memory_space<vmem>>, vector<2x64xf32>
    tpu.vector_store %arg22[%c10, %c0_35], %34 {strides = array<i32>} : memref<24x64xf32, #tpu.memory_space<vmem>>, vector<2x64xf32>,
    %36 = vector.extract_strided_slice %31 {offsets = [0, 0], sizes = [8, 64], strides = [1, 1]} : vector<16x64xf32> to vector<8x64xf32>
    %c2_36 = arith.constant 2 : index
    %c0_37 = arith.constant 0 : index
    %37 = vector.load %arg22[%c2_36, %c0_37] : memref<24x64xf32, #tpu.memory_space<vmem>>, vector<8x64xf32>
    tpu.vector_store %arg22[%c2_36, %c0_37], %36 {strides = array<i32>} : memref<24x64xf32, #tpu.memory_space<vmem>>, vector<8x64xf32>,
    %cst_38 = arith.constant 0.000000e+00 : f32
    %38 = vector.broadcast %cst_38 : f32 to vector<2x64xf32>
    %c12 = arith.constant 12 : index
    %c0_39 = arith.constant 0 : index
    %39 = vector.load %arg22[%c12, %c0_39] : memref<24x64xf32, #tpu.memory_space<vmem>>, vector<2x64xf32>
    tpu.vector_store %arg22[%c12, %c0_39], %38 {strides = array<i32>} : memref<24x64xf32, #tpu.memory_space<vmem>>, vector<2x64xf32>,
    %cst_40 = arith.constant 0.000000e+00 : f32
    %40 = vector.broadcast %cst_40 : f32 to vector<2x64xf32>
    %c22_41 = arith.constant 22 : index
    %c0_42 = arith.constant 0 : index
    %41 = vector.load %arg22[%c22_41, %c0_42] : memref<24x64xf32, #tpu.memory_space<vmem>>, vector<2x64xf32>
    tpu.vector_store %arg22[%c22_41, %c0_42], %40 {strides = array<i32>} : memref<24x64xf32, #tpu.memory_space<vmem>>, vector<2x64xf32>,
    %42 = vector.extract_strided_slice %31 {offsets = [8, 0], sizes = [8, 64], strides = [1, 1]} : vector<16x64xf32> to vector<8x64xf32>
    %c14 = arith.constant 14 : index
    %c0_43 = arith.constant 0 : index
    %43 = vector.load %arg22[%c14, %c0_43] : memref<24x64xf32, #tpu.memory_space<vmem>>, vector<8x64xf32>
    tpu.vector_store %arg22[%c14, %c0_43], %42 {strides = array<i32>} : memref<24x64xf32, #tpu.memory_space<vmem>>, vector<8x64xf32>,
    %c0_44 = arith.constant 0 : index
    %c0_45 = arith.constant 0 : index
    %44 = vector.load %arg22[%c0_44, %c0_45] : memref<24x64xf32, #tpu.memory_space<vmem>>, vector<20x64xf32>
    %c1_46 = arith.constant 1 : index
    %c0_47 = arith.constant 0 : index
    %45 = vector.load %arg22[%c1_46, %c0_47] : memref<24x64xf32, #tpu.memory_space<vmem>>, vector<20x64xf32>
    %c2_48 = arith.constant 2 : index
    %c0_49 = arith.constant 0 : index
    %46 = vector.load %arg22[%c2_48, %c0_49] : memref<24x64xf32, #tpu.memory_space<vmem>>, vector<20x64xf32>
    %c3_50 = arith.constant 3 : index
    %c0_51 = arith.constant 0 : index
    %47 = vector.load %arg22[%c3_50, %c0_51] : memref<24x64xf32, #tpu.memory_space<vmem>>, vector<20x64xf32>
    %c4_52 = arith.constant 4 : index
    %c0_53 = arith.constant 0 : index
    %48 = vector.load %arg22[%c4_52, %c0_53] : memref<24x64xf32, #tpu.memory_space<vmem>>, vector<20x64xf32>
    %49 = tpu.concatenate %44, %45, %46, %47, %48 in 1 : vector<20x64xf32>, vector<20x64xf32>, vector<20x64xf32>, vector<20x64xf32>, vector<20x64xf32> -> vector<20x320xf32>
    %c0_54 = arith.constant 0 : index
    %c0_55 = arith.constant 0 : index
    %50 = vector.load %arg3[%c0_54, %c0_55] : memref<320x32xf32, #tpu.memory_space<vmem>>, vector<320x32xf32>
    %cst_56 = arith.constant dense<0.000000e+00> : vector<20x32xf32>
    %51 = tpu.matmul %49, %50, %cst_56 {dimension_numbers = #tpu.dot_dimension_numbers<[1], [0], [0], [1], [0, 0, 1, 1], [], []>} : vector<20x320xf32>, vector<320x32xf32>, vector<20x32xf32> -> vector<20x32xf32>
    %c0_57 = arith.constant 0 : index
    %c0_58 = arith.constant 0 : index
    %52 = vector.load %arg13[%c0_57, %c0_58] : memref<32x20xf32, #tpu.memory_space<vmem>>, vector<32x20xf32>
    %cst_59 = arith.constant dense<0.000000e+00> : vector<32x32xf32>
    %53 = tpu.matmul %52, %51, %cst_59 {dimension_numbers = #tpu.dot_dimension_numbers<[1], [0], [0], [1], [0, 0, 1, 1], [], []>} : vector<32x20xf32>, vector<20x32xf32>, vector<32x32xf32> -> vector<32x32xf32>
    %54 = vector.extract_strided_slice %53 {offsets = [0, 0], sizes = [16, 32], strides = [1, 1]} : vector<32x32xf32> to vector<16x32xf32>
    %55 = vector.extract_strided_slice %53 {offsets = [16, 0], sizes = [16, 32], strides = [1, 1]} : vector<32x32xf32> to vector<16x32xf32>
    %56 = arith.maximumf %54, %55 : vector<16x32xf32>
    %c0_60 = arith.constant 0 : index
    %c0_61 = arith.constant 0 : index
    %57 = vector.load %arg4[%c0_60, %c0_61] : memref<1x32xf32, #tpu.memory_space<vmem>>, vector<1x32xf32>
    %58 = vector.broadcast %57 : vector<1x32xf32> to vector<16x32xf32>
    %59 = arith.addf %56, %58 : vector<16x32xf32>
    %cst_62 = arith.constant 0.000000e+00 : f32
    %60 = vector.broadcast %cst_62 : f32 to vector<16x32xf32>
    %61 = arith.maximumf %59, %60 : vector<16x32xf32>
    %62 = vector.extract_strided_slice %61 {offsets = [0, 0], sizes = [8, 32], strides = [1, 1]} : vector<16x32xf32> to vector<8x32xf32>
    %63 = vector.extract_strided_slice %61 {offsets = [8, 0], sizes = [8, 32], strides = [1, 1]} : vector<16x32xf32> to vector<8x32xf32>
    %64 = tpu.concatenate %62, %63 in 1 : vector<8x32xf32>, vector<8x32xf32> -> vector<8x64xf32>
    %c0_63 = arith.constant 0 : index
    %c0_64 = arith.constant 0 : index
    %65 = vector.load %arg5[%c0_63, %c0_64] : memref<64x128xf32, #tpu.memory_space<vmem>>, vector<64x128xf32>
    %cst_65 = arith.constant dense<0.000000e+00> : vector<8x128xf32>
    %66 = tpu.matmul %64, %65, %cst_65 {dimension_numbers = #tpu.dot_dimension_numbers<[1], [0], [0], [1], [0, 0, 1, 1], [], []>} : vector<8x64xf32>, vector<64x128xf32>, vector<8x128xf32> -> vector<8x128xf32>
    %c0_66 = arith.constant 0 : index
    %c0_67 = arith.constant 0 : index
    %67 = vector.load %arg6[%c0_66, %c0_67] : memref<1x128xf32, #tpu.memory_space<vmem>>, vector<1x128xf32>
    %68 = vector.broadcast %67 : vector<1x128xf32> to vector<8x128xf32>
    %69 = arith.addf %66, %68 : vector<8x128xf32>
    %cst_68 = arith.constant 0.000000e+00 : f32
    %70 = vector.broadcast %cst_68 : f32 to vector<2x32xf32>
    %cst_69 = arith.constant 0.000000e+00 : f32
    %71 = vector.broadcast %cst_69 : f32 to vector<2x32xf32>
    %72 = vector.extract_strided_slice %69 {offsets = [0, 0], sizes = [2, 128], strides = [1, 1]} : vector<8x128xf32> to vector<2x128xf32>
    %c0_70 = arith.constant 0 : index
    %c0_71 = arith.constant 0 : index
    %73 = vector.load %arg7[%c0_70, %c0_71] : memref<32x128xf32, #tpu.memory_space<vmem>>, vector<32x128xf32>
    %cst_72 = arith.constant dense<0.000000e+00> : vector<2x128xf32>
    %74 = tpu.matmul %70, %73, %cst_72 {dimension_numbers = #tpu.dot_dimension_numbers<[1], [0], [0], [1], [0, 0, 1, 1], [], []>} : vector<2x32xf32>, vector<32x128xf32>, vector<2x128xf32> -> vector<2x128xf32>
    %75 = arith.addf %72, %74 : vector<2x128xf32>
    %76 = arith.negf %75 : vector<2x128xf32>
    %77 = math.exp %76 : vector<2x128xf32>
    %cst_73 = arith.constant 1.000000e+00 : f32
    %78 = vector.broadcast %cst_73 : f32 to vector<2x128xf32>
    %79 = arith.addf %78, %77 : vector<2x128xf32>
    %80 = arith.divf %78, %79 : vector<2x128xf32>
    %81 = math.tanh %75 : vector<2x128xf32>
    %82 = vector.extract_strided_slice %80 {offsets = [0, 0], sizes = [2, 32], strides = [1, 1]} : vector<2x128xf32> to vector<2x32xf32>
    %83 = vector.extract_strided_slice %80 {offsets = [0, 32], sizes = [2, 32], strides = [1, 1]} : vector<2x128xf32> to vector<2x32xf32>
    %84 = vector.extract_strided_slice %81 {offsets = [0, 64], sizes = [2, 32], strides = [1, 1]} : vector<2x128xf32> to vector<2x32xf32>
    %85 = vector.extract_strided_slice %80 {offsets = [0, 96], sizes = [2, 32], strides = [1, 1]} : vector<2x128xf32> to vector<2x32xf32>
    %86 = arith.mulf %83, %71 : vector<2x32xf32>
    %87 = arith.mulf %82, %84 : vector<2x32xf32>
    %88 = arith.addf %86, %87 : vector<2x32xf32>
    %89 = math.tanh %88 : vector<2x32xf32>
    %90 = arith.mulf %85, %89 : vector<2x32xf32>
    %91 = vector.extract_strided_slice %69 {offsets = [2, 0], sizes = [2, 128], strides = [1, 1]} : vector<8x128xf32> to vector<2x128xf32>
    %c0_74 = arith.constant 0 : index
    %c0_75 = arith.constant 0 : index
    %92 = vector.load %arg7[%c0_74, %c0_75] : memref<32x128xf32, #tpu.memory_space<vmem>>, vector<32x128xf32>
    %cst_76 = arith.constant dense<0.000000e+00> : vector<2x128xf32>
    %93 = tpu.matmul %90, %92, %cst_76 {dimension_numbers = #tpu.dot_dimension_numbers<[1], [0], [0], [1], [0, 0, 1, 1], [], []>} : vector<2x32xf32>, vector<32x128xf32>, vector<2x128xf32> -> vector<2x128xf32>
    %94 = arith.addf %91, %93 : vector<2x128xf32>
    %95 = arith.negf %94 : vector<2x128xf32>
    %96 = math.exp %95 : vector<2x128xf32>
    %cst_77 = arith.constant 1.000000e+00 : f32
    %97 = vector.broadcast %cst_77 : f32 to vector<2x128xf32>
    %98 = arith.addf %97, %96 : vector<2x128xf32>
    %99 = arith.divf %97, %98 : vector<2x128xf32>
    %100 = math.tanh %94 : vector<2x128xf32>
    %101 = vector.extract_strided_slice %99 {offsets = [0, 0], sizes = [2, 32], strides = [1, 1]} : vector<2x128xf32> to vector<2x32xf32>
    %102 = vector.extract_strided_slice %99 {offsets = [0, 32], sizes = [2, 32], strides = [1, 1]} : vector<2x128xf32> to vector<2x32xf32>
    %103 = vector.extract_strided_slice %100 {offsets = [0, 64], sizes = [2, 32], strides = [1, 1]} : vector<2x128xf32> to vector<2x32xf32>
    %104 = vector.extract_strided_slice %99 {offsets = [0, 96], sizes = [2, 32], strides = [1, 1]} : vector<2x128xf32> to vector<2x32xf32>
    %105 = arith.mulf %102, %88 : vector<2x32xf32>
    %106 = arith.mulf %101, %103 : vector<2x32xf32>
    %107 = arith.addf %105, %106 : vector<2x32xf32>
    %108 = math.tanh %107 : vector<2x32xf32>
    %109 = arith.mulf %104, %108 : vector<2x32xf32>
    %110 = vector.extract_strided_slice %69 {offsets = [4, 0], sizes = [2, 128], strides = [1, 1]} : vector<8x128xf32> to vector<2x128xf32>
    %c0_78 = arith.constant 0 : index
    %c0_79 = arith.constant 0 : index
    %111 = vector.load %arg7[%c0_78, %c0_79] : memref<32x128xf32, #tpu.memory_space<vmem>>, vector<32x128xf32>
    %cst_80 = arith.constant dense<0.000000e+00> : vector<2x128xf32>
    %112 = tpu.matmul %109, %111, %cst_80 {dimension_numbers = #tpu.dot_dimension_numbers<[1], [0], [0], [1], [0, 0, 1, 1], [], []>} : vector<2x32xf32>, vector<32x128xf32>, vector<2x128xf32> -> vector<2x128xf32>
    %113 = arith.addf %110, %112 : vector<2x128xf32>
    %114 = arith.negf %113 : vector<2x128xf32>
    %115 = math.exp %114 : vector<2x128xf32>
    %cst_81 = arith.constant 1.000000e+00 : f32
    %116 = vector.broadcast %cst_81 : f32 to vector<2x128xf32>
    %117 = arith.addf %116, %115 : vector<2x128xf32>
    %118 = arith.divf %116, %117 : vector<2x128xf32>
    %119 = math.tanh %113 : vector<2x128xf32>
    %120 = vector.extract_strided_slice %118 {offsets = [0, 0], sizes = [2, 32], strides = [1, 1]} : vector<2x128xf32> to vector<2x32xf32>
    %121 = vector.extract_strided_slice %118 {offsets = [0, 32], sizes = [2, 32], strides = [1, 1]} : vector<2x128xf32> to vector<2x32xf32>
    %122 = vector.extract_strided_slice %119 {offsets = [0, 64], sizes = [2, 32], strides = [1, 1]} : vector<2x128xf32> to vector<2x32xf32>
    %123 = vector.extract_strided_slice %118 {offsets = [0, 96], sizes = [2, 32], strides = [1, 1]} : vector<2x128xf32> to vector<2x32xf32>
    %124 = arith.mulf %121, %107 : vector<2x32xf32>
    %125 = arith.mulf %120, %122 : vector<2x32xf32>
    %126 = arith.addf %124, %125 : vector<2x32xf32>
    %127 = math.tanh %126 : vector<2x32xf32>
    %128 = arith.mulf %123, %127 : vector<2x32xf32>
    %129 = vector.extract_strided_slice %69 {offsets = [6, 0], sizes = [2, 128], strides = [1, 1]} : vector<8x128xf32> to vector<2x128xf32>
    %c0_82 = arith.constant 0 : index
    %c0_83 = arith.constant 0 : index
    %130 = vector.load %arg7[%c0_82, %c0_83] : memref<32x128xf32, #tpu.memory_space<vmem>>, vector<32x128xf32>
    %cst_84 = arith.constant dense<0.000000e+00> : vector<2x128xf32>
    %131 = tpu.matmul %128, %130, %cst_84 {dimension_numbers = #tpu.dot_dimension_numbers<[1], [0], [0], [1], [0, 0, 1, 1], [], []>} : vector<2x32xf32>, vector<32x128xf32>, vector<2x128xf32> -> vector<2x128xf32>
    %132 = arith.addf %129, %131 : vector<2x128xf32>
    %133 = arith.negf %132 : vector<2x128xf32>
    %134 = math.exp %133 : vector<2x128xf32>
    %cst_85 = arith.constant 1.000000e+00 : f32
    %135 = vector.broadcast %cst_85 : f32 to vector<2x128xf32>
    %136 = arith.addf %135, %134 : vector<2x128xf32>
    %137 = arith.divf %135, %136 : vector<2x128xf32>
    %138 = math.tanh %132 : vector<2x128xf32>
    %139 = vector.extract_strided_slice %137 {offsets = [0, 0], sizes = [2, 32], strides = [1, 1]} : vector<2x128xf32> to vector<2x32xf32>
    %140 = vector.extract_strided_slice %137 {offsets = [0, 32], sizes = [2, 32], strides = [1, 1]} : vector<2x128xf32> to vector<2x32xf32>
    %141 = vector.extract_strided_slice %138 {offsets = [0, 64], sizes = [2, 32], strides = [1, 1]} : vector<2x128xf32> to vector<2x32xf32>
    %142 = vector.extract_strided_slice %137 {offsets = [0, 96], sizes = [2, 32], strides = [1, 1]} : vector<2x128xf32> to vector<2x32xf32>
    %143 = arith.mulf %140, %126 : vector<2x32xf32>
    %144 = arith.mulf %139, %141 : vector<2x32xf32>
    %145 = arith.addf %143, %144 : vector<2x32xf32>
    %146 = math.tanh %145 : vector<2x32xf32>
    %147 = arith.mulf %142, %146 : vector<2x32xf32>
    %148 = tpu.concatenate %90, %109, %128, %147 in 1 : vector<2x32xf32>, vector<2x32xf32>, vector<2x32xf32>, vector<2x32xf32> -> vector<2x128xf32>
    %c0_86 = arith.constant 0 : index
    %c0_87 = arith.constant 0 : index
    %149 = vector.load %arg14[%c0_86, %c0_87] : memref<128x64xf32, #tpu.memory_space<vmem>>, vector<128x64xf32>
    %cst_88 = arith.constant dense<0.000000e+00> : vector<2x64xf32>
    %150 = tpu.matmul %148, %149, %cst_88 {dimension_numbers = #tpu.dot_dimension_numbers<[1], [0], [0], [1], [0, 0, 1, 1], [], []>} : vector<2x128xf32>, vector<128x64xf32>, vector<2x64xf32> -> vector<2x64xf32>
    %c0_89 = arith.constant 0 : index
    %c0_90 = arith.constant 0 : index
    %151 = vector.load %arg15[%c0_89, %c0_90] : memref<32x64xf32, #tpu.memory_space<vmem>>, vector<32x64xf32>
    %cst_91 = arith.constant dense<0.000000e+00> : vector<2x64xf32>
    %152 = tpu.matmul %147, %151, %cst_91 {dimension_numbers = #tpu.dot_dimension_numbers<[1], [0], [0], [1], [0, 0, 1, 1], [], []>} : vector<2x32xf32>, vector<32x64xf32>, vector<2x64xf32> -> vector<2x64xf32>
    %153 = arith.mulf %150, %152 : vector<2x64xf32>
    %c0_92 = arith.constant 0 : index
    %c0_93 = arith.constant 0 : index
    %154 = vector.load %arg16[%c0_92, %c0_93] : memref<64x4xf32, #tpu.memory_space<vmem>>, vector<64x4xf32>
    %cst_94 = arith.constant dense<0.000000e+00> : vector<2x4xf32>
    %155 = tpu.matmul %153, %154, %cst_94 {dimension_numbers = #tpu.dot_dimension_numbers<[1], [0], [0], [1], [0, 0, 1, 1], [], []>} : vector<2x64xf32>, vector<64x4xf32>, vector<2x4xf32> -> vector<2x4xf32>
    %cst_95 = arith.constant dense<0xFF800000> : vector<2xf32>
    %156 = vector.multi_reduction <maximumf>, %155, %cst_95 [1] : vector<2x4xf32> to vector<2xf32>
    %157 = vector.shape_cast %156 : vector<2xf32> to vector<2x1xf32>
    %158 = vector.broadcast %157 : vector<2x1xf32> to vector<2x4xf32>
    %159 = arith.subf %155, %158 : vector<2x4xf32>
    %160 = math.exp %159 : vector<2x4xf32>
    %cst_96 = arith.constant dense<0.000000e+00> : vector<2xf32>
    %161 = vector.multi_reduction <add>, %160, %cst_96 [1] : vector<2x4xf32> to vector<2xf32>
    %162 = vector.shape_cast %161 : vector<2xf32> to vector<2x1xf32>
    %163 = tpu.reciprocal %162 {approx = true} : vector<2x1xf32> -> vector<2x1xf32>
    %164 = vector.broadcast %163 : vector<2x1xf32> to vector<2x4xf32>
    %165 = arith.mulf %160, %164 : vector<2x4xf32>
    %c0_97 = arith.constant 0 : index
    %c0_98 = arith.constant 0 : index
    %166 = vector.load %arg20[%c0_97, %c0_98] : memref<2x4xf32, #tpu.memory_space<vmem>>, vector<2x4xf32>
    tpu.vector_store %arg20[%c0_97, %c0_98], %165 {strides = array<i32>} : memref<2x4xf32, #tpu.memory_space<vmem>>, vector<2x4xf32>,
    %c0_99 = arith.constant 0 : index
    %c0_100 = arith.constant 0 : index
    %167 = vector.load %arg17[%c0_99, %c0_100] : memref<4x64xf32, #tpu.memory_space<vmem>>, vector<4x64xf32>
    %cst_101 = arith.constant dense<0.000000e+00> : vector<2x64xf32>
    %168 = tpu.matmul %165, %167, %cst_101 {dimension_numbers = #tpu.dot_dimension_numbers<[1], [0], [0], [1], [0, 0, 1, 1], [], []>} : vector<2x4xf32>, vector<4x64xf32>, vector<2x64xf32> -> vector<2x64xf32>
    %169 = arith.mulf %150, %168 : vector<2x64xf32>
    %c0_102 = arith.constant 0 : index
    %c0_103 = arith.constant 0 : index
    %170 = vector.load %arg18[%c0_102, %c0_103] : memref<64x16xf32, #tpu.memory_space<vmem>>, vector<64x16xf32>
    %cst_104 = arith.constant dense<0.000000e+00> : vector<2x16xf32>
    %171 = tpu.matmul %169, %170, %cst_104 {dimension_numbers = #tpu.dot_dimension_numbers<[1], [0], [0], [1], [0, 0, 1, 1], [], []>} : vector<2x64xf32>, vector<64x16xf32>, vector<2x16xf32> -> vector<2x16xf32>
    %172 = math.tanh %171 : vector<2x16xf32>
    %c0_105 = arith.constant 0 : index
    %c0_106 = arith.constant 0 : index
    %173 = vector.load %arg8[%c0_105, %c0_106] : memref<16x8xf32, #tpu.memory_space<vmem>>, vector<16x8xf32>
    %cst_107 = arith.constant dense<0.000000e+00> : vector<2x8xf32>
    %174 = tpu.matmul %172, %173, %cst_107 {dimension_numbers = #tpu.dot_dimension_numbers<[1], [0], [0], [1], [0, 0, 1, 1], [], []>} : vector<2x16xf32>, vector<16x8xf32>, vector<2x8xf32> -> vector<2x8xf32>
    %c0_108 = arith.constant 0 : index
    %c0_109 = arith.constant 0 : index
    %175 = vector.load %arg9[%c0_108, %c0_109] : memref<1x8xf32, #tpu.memory_space<vmem>>, vector<1x8xf32>
    %176 = vector.broadcast %175 : vector<1x8xf32> to vector<2x8xf32>
    %177 = arith.addf %174, %176 : vector<2x8xf32>
    %c0_110 = arith.constant 0 : index
    %c0_111 = arith.constant 0 : index
    %178 = vector.load %arg10[%c0_110, %c0_111] : memref<8x1xf32, #tpu.memory_space<vmem>>, vector<8x1xf32>
    %cst_112 = arith.constant dense<0.000000e+00> : vector<2x1xf32>
    %179 = tpu.matmul %177, %178, %cst_112 {dimension_numbers = #tpu.dot_dimension_numbers<[1], [0], [0], [1], [0, 0, 1, 1], [], []>} : vector<2x8xf32>, vector<8x1xf32>, vector<2x1xf32> -> vector<2x1xf32>
    %c0_113 = arith.constant 0 : index
    %c0_114 = arith.constant 0 : index
    %180 = vector.load %arg11[%c0_113, %c0_114] : memref<1x1xf32, #tpu.memory_space<vmem>>, vector<1x1xf32>
    %181 = vector.broadcast %180 : vector<1x1xf32> to vector<2x1xf32>
    %182 = arith.addf %179, %181 : vector<2x1xf32>
    %183 = arith.negf %182 : vector<2x1xf32>
    %184 = math.exp %183 : vector<2x1xf32>
    %cst_115 = arith.constant 1.000000e+00 : f32
    %185 = vector.broadcast %cst_115 : f32 to vector<2x1xf32>
    %186 = arith.addf %185, %184 : vector<2x1xf32>
    %187 = arith.divf %185, %186 : vector<2x1xf32>
    %c0_116 = arith.constant 0 : index
    %c0_117 = arith.constant 0 : index
    %188 = vector.load %arg19[%c0_116, %c0_117] : memref<2x1xf32, #tpu.memory_space<vmem>>, vector<2x1xf32>
    tpu.vector_store %arg19[%c0_116, %c0_117], %187 {strides = array<i32>} : memref<2x1xf32, #tpu.memory_space<vmem>>, vector<2x1xf32>,
    return
  }
}

</mosaic_0001>

<bundles_post_ra>
// kernel: arc_forward.1
= control target key start
LH: loop header
LB: loop body
LE: loop exit
PB: predicated region body
PF: predicated region fallthrough
CT: control target
= control target key end

     0   :  { %s3867_s0 = inlined_call_operand.vmem [shape: f32[2,16,128], index: 0, kind: input, shape index: {}]   ;;  %s3868_s1 = inlined_call_operand.vmem [shape: f32[640,64], index: 1, kind: input, shape index: {}]   ;;  %s3869_s2 = inlined_call_operand.vmem [shape: f32[1,64], index: 2, kind: input, shape index: {}]   ;;  %s3870_s3 = inlined_call_operand.vmem [shape: f32[320,32], index: 3, kind: input, shape index: {}]   ;;  %s3871_s4 = inlined_call_operand.vmem [shape: f32[1,32], index: 4, kind: input, shape index: {}]   ;;  %s3872_s5 = inlined_call_operand.vmem [shape: f32[64,128], index: 5, kind: input, shape index: {}]   ;;  %s3873_s6 = inlined_call_operand.vmem [shape: f32[1,128], index: 6, kind: input, shape index: {}]   ;;  %s3874_s7 = inlined_call_operand.vmem [shape: f32[32,128], index: 7, kind: input, shape index: {}]   ;;  %s3875_s8 = inlined_call_operand.vmem [shape: f32[16,8], index: 8, kind: input, shape index: {}]   ;;  %s3876_s9 = inlined_call_operand.vmem [shape: f32[1,8], index: 9, kind: input, shape index: {}]   ;;  %s3877_s10 = inlined_call_operand.vmem [shape: f32[8,1], index: 10, kind: input, shape index: {}]   ;;  %s3878_s11 = inlined_call_operand.<no memory space> [shape: f32[1,1], index: 11, kind: input, shape index: {}]   ;;  %s3879_s12 = inlined_call_operand.vmem [shape: f32[32,36], index: 12, kind: input, shape index: {}]   ;;  %s3880_s13 = inlined_call_operand.vmem [shape: f32[32,20], index: 13, kind: input, shape index: {}]   ;;  %s3881_s14 = inlined_call_operand.vmem [shape: f32[128,64], index: 14, kind: input, shape index: {}]   ;;  %s3882_s15 = inlined_call_operand.vmem [shape: f32[32,64], index: 15, kind: input, shape index: {}]   ;;  %s3883_s16 = inlined_call_operand.vmem [shape: f32[64,4], index: 16, kind: input, shape index: {}]   ;;  %s3884_s17 = inlined_call_operand.vmem [shape: f32[4,64], index: 17, kind: input, shape index: {}]   ;;  %s3885_s18 = inlined_call_operand.vmem [shape: f32[64,16], index: 18, kind: input, shape index: {}]   ;;  %s3886_s19 = inlined_call_operand.vmem [shape: f32[2,1], index: 19, kind: output, shape index: {0}]   ;;  %s3887_s20 = inlined_call_operand.hbm [shape: f32[2,4], index: 20, kind: output, shape index: {1}]  }
   0x1   :  { %3891 = sst [smem:[#allocation8_spill]] %s3867_s0  ;;  %v26_v0 = vstv %s3878_s11 }
   0x2   :  { %3892 = sst [smem:[#allocation9_spill]] %s3868_s1  ;;  %27 = vst [vmem:[#allocation4] sm:$0x1] %v26_v0 }
   0x3   :  { %3893 = sst [smem:[#allocation10_spill]] %s3869_s2 }
   0x4   :  { %3894 = sst [smem:[#allocation11_spill]] %s3870_s3 }
   0x5   :  { %3895 = sst [smem:[#allocation12_spill]] %s3871_s4 }
   0x6   :  { %s3896_s2 = sld [smem:[#allocation9_spill]]  ;;  %v2979_v8 = vmov 0.0   ;;  %s3897_s4 = sld [smem:[#allocation8_spill]] }
   0x7   :  { %67 = vst [vmem:[#allocation2] sm:$0x3] %v2979_v8  ;;  %68 = vst [vmem:[#allocation2 + $0x12] sm:$0x3] %v2979_v8 }
   0x8   :  { %73 = vst [vmem:[#allocation2 + $0x14] sm:$0x3] %v2979_v8  ;;  %74 = vst [vmem:[#allocation2 + $0x26] sm:$0x3] %v2979_v8 }
   0xc   :  { %v121_v1 = vld [vmem:[%s3896_s2 + $0x80] sm:$0xff]  ;;  %v122_v2 = vld [vmem:[%s3896_s2 + $0x88] sm:$0xff]  ;;  %v123_v13 = vld [vmem:[%s3896_s2 + $0x90] sm:$0xff] }
   0xd   :  { %v153_v3 = vld [vmem:[%s3896_s2 + $0x180] sm:$0xff]  ;;  %v2654_v4 = vpack.c.bf16 %v122_v2, %v121_v1  ;;  %v154_v5 = vld [vmem:[%s3896_s2 + $0x188] sm:$0xff]  ;;  %v124_v15 = vld [vmem:[%s3896_s2 + $0x98] sm:$0xff] }
   0xe   :  { %v105_v6 = vld [vmem:[%s3896_s2] sm:$0xff]  ;;  %v106_v7 = vld [vmem:[%s3896_s2 + $0x8] sm:$0xff]  ;;  %v2686_v9 = vpack.c.bf16 %v154_v5, %v153_v3  ;;  %v155_v16 = vld [vmem:[%s3896_s2 + $0x190] sm:$0xff]  ;;  %v2658_v18 = vpack.c.bf16 %v124_v15, %v123_v13 }
   0xf   :  { %v2656_v10 = vpack.c.bf16 %v106_v7, %v105_v6  ;;  %v137_v11 = vld [vmem:[%s3896_s2 + $0x100] sm:$0xff]  ;;  %v138_v12 = vld [vmem:[%s3896_s2 + $0x108] sm:$0xff]  ;;  %2655 = vmatprep.subr.bf16.mxu0 %v2654_v4  ;;  %v156_v17 = vld [vmem:[%s3896_s2 + $0x198] sm:$0xff] }
  0x10   :  { %v2688_v14 = vpack.c.bf16 %v138_v12, %v137_v11  ;;  %2687 = vmatprep.subr.bf16.mxu1 %v2686_v9  ;;  %v2690_v19 = vpack.c.bf16 %v156_v17, %v155_v16  ;;  %v107_v20 = vld [vmem:[%s3896_s2 + $0x10] sm:$0xff]  ;;  %v108_v21 = vld [vmem:[%s3896_s2 + $0x18] sm:$0xff]  ;;  %v125_v25 = vld [vmem:[%s3896_s2 + $0xa0] sm:$0xff] }
  0x11   :  { %2657 = vmatpush3.bf16.msra.mxu0 %v2656_v10  ;;  %v139_v22 = vld [vmem:[%s3896_s2 + $0x110] sm:$0xff]  ;;  %v2660_v23 = vpack.c.bf16 %v108_v21, %v107_v20  ;;  %v140_v24 = vld [vmem:[%s3896_s2 + $0x118] sm:$0xff]  ;;  %v126_v26 = vld [vmem:[%s3896_s2 + $0xa8] sm:$0xff] }
  0x12   :  { %2689 = vmatpush3.bf16.msra.mxu1 %v2688_v14  ;;  %2659 = vmatprep.subr.bf16.mxu0 %v2658_v18  ;;  %v2692_v27 = vpack.c.bf16 %v140_v24, %v139_v22  ;;  %v2662_v28 = vpack.c.bf16 %v126_v26, %v125_v25  ;;  %v157_v29 = vld [vmem:[%s3896_s2 + $0x1a0] sm:$0xff]  ;;  %v158_v30 = vld [vmem:[%s3896_s2 + $0x1a8] sm:$0xff]  ;;  %v127_v37 = vld [vmem:[%s3896_s2 + $0xb0] sm:$0xff] }
  0x13   :  { %2691 = vmatprep.subr.bf16.mxu1 %v2690_v19  ;;  %v109_v31 = vld [vmem:[%s3896_s2 + $0x20] sm:$0xff]  ;;  %v2694_v32 = vpack.c.bf16 %v158_v30, %v157_v29  ;;  %v110_v33 = vld [vmem:[%s3896_s2 + $0x28] sm:$0xff]  ;;  %v128_v38 = vld [vmem:[%s3896_s2 + $0xb8] sm:$0xff] }
  0x14   :  { %v141_v34 = vld [vmem:[%s3896_s2 + $0x120] sm:$0xff]  ;;  %v142_v35 = vld [vmem:[%s3896_s2 + $0x128] sm:$0xff]  ;;  %v2664_v36 = vpack.c.bf16 %v110_v33, %v109_v31  ;;  %v159_v39 = vld [vmem:[%s3896_s2 + $0x1b0] sm:$0xff]  ;;  %v2666_v41 = vpack.c.bf16 %v128_v38, %v127_v37 }
  0x15   :  { %2661 = vmatpush3.bf16.msra.mxu0 %v2660_v23  ;;  %v2696_v40 = vpack.c.bf16 %v142_v35, %v141_v34  ;;  %v160_v42 = vld [vmem:[%s3896_s2 + $0x1b8] sm:$0xff]  ;;  %v111_v43 = vld [vmem:[%s3896_s2 + $0x30] sm:$0xff]  ;;  %v129_v48 = vld [vmem:[%s3896_s2 + $0xc0] sm:$0xff] }
  0x16   :  { %2693 = vmatpush3.bf16.msra.mxu1 %v2692_v27  ;;  %2663 = vmatprep.subr.bf16.mxu0 %v2662_v28  ;;  %v112_v44 = vld [vmem:[%s3896_s2 + $0x38] sm:$0xff]  ;;  %v2698_v45 = vpack.c.bf16 %v160_v42, %v159_v39  ;;  %v143_v46 = vld [vmem:[%s3896_s2 + $0x130] sm:$0xff]  ;;  %v130_v49 = vld [vmem:[%s3896_s2 + $0xc8] sm:$0xff] }
  0x17   :  { %2695 = vmatprep.subr.bf16.mxu1 %v2694_v32  ;;  %v144_v47 = vld [vmem:[%s3896_s2 + $0x138] sm:$0xff]  ;;  %v161_v50 = vld [vmem:[%s3896_s2 + $0x1c0] sm:$0xff]  ;;  %v162_v51 = vld [vmem:[%s3896_s2 + $0x1c8] sm:$0xff]  ;;  %v2668_v52 = vpack.c.bf16 %v112_v44, %v111_v43  ;;  %v2670_v54 = vpack.c.bf16 %v130_v49, %v129_v48 }
  0x18   :  { %v2700_v53 = vpack.c.bf16 %v144_v47, %v143_v46  ;;  %v113_v55 = vld [vmem:[%s3896_s2 + $0x40] sm:$0xff]  ;;  %v114_v56 = vld [vmem:[%s3896_s2 + $0x48] sm:$0xff]  ;;  %v2702_v58 = vpack.c.bf16 %v162_v51, %v161_v50  ;;  %v131_v60 = vld [vmem:[%s3896_s2 + $0xd0] sm:$0xff] }
  0x19   :  { %2665 = vmatpush3.bf16.msra.mxu0 %v2664_v36  ;;  %v145_v57 = vld [vmem:[%s3896_s2 + $0x140] sm:$0xff]  ;;  %v146_v59 = vld [vmem:[%s3896_s2 + $0x148] sm:$0xff]  ;;  %v132_v61 = vld [vmem:[%s3896_s2 + $0xd8] sm:$0xff]  ;;  %v2672_v0 = vpack.c.bf16 %v114_v56, %v113_v55 }
  0x1a   :  { %2697 = vmatpush3.bf16.msra.mxu1 %v2696_v40  ;;  %2667 = vmatprep.subr.bf16.mxu0 %v2666_v41  ;;  %v163_v62 = vld [vmem:[%s3896_s2 + $0x1d0] sm:$0xff]  ;;  %v164_v63 = vld [vmem:[%s3896_s2 + $0x1d8] sm:$0xff]  ;;  %v2704_v1 = vpack.c.bf16 %v146_v59, %v145_v57  ;;  %v2674_v2 = vpack.c.bf16 %v132_v61, %v131_v60  ;;  %v133_v9 = vld [vmem:[%s3896_s2 + $0xe0] sm:$0xff] }
  0x1b   :  { %2699 = vmatprep.subr.bf16.mxu1 %v2698_v45  ;;  %v115_v3 = vld [vmem:[%s3896_s2 + $0x50] sm:$0xff]  ;;  %v116_v4 = vld [vmem:[%s3896_s2 + $0x58] sm:$0xff]  ;;  %v2706_v6 = vpack.c.bf16 %v164_v63, %v163_v62  ;;  %v134_v10 = vld [vmem:[%s3896_s2 + $0xe8] sm:$0xff] }
  0x1c   :  { %v147_v5 = vld [vmem:[%s3896_s2 + $0x150] sm:$0xff]  ;;  %v148_v7 = vld [vmem:[%s3896_s2 + $0x158] sm:$0xff]  ;;  %v165_v11 = vld [vmem:[%s3896_s2 + $0x1e0] sm:$0xff]  ;;  %v2676_v13 = vpack.c.bf16 %v116_v4, %v115_v3  ;;  %v2678_v17 = vpack.c.bf16 %v134_v10, %v133_v9 }
  0x1d   :  { %2669 = vmatpush3.bf16.msra.mxu0 %v2668_v52  ;;  %v166_v12 = vld [vmem:[%s3896_s2 + $0x1e8] sm:$0xff]  ;;  %v117_v14 = vld [vmem:[%s3896_s2 + $0x60] sm:$0xff]  ;;  %v2708_v16 = vpack.c.bf16 %v148_v7, %v147_v5  ;;  %v135_v23 = vld [vmem:[%s3896_s2 + $0xf0] sm:$0xff] }
  0x1e   :  { %2701 = vmatpush3.bf16.msra.mxu1 %v2700_v53  ;;  %2671 = vmatprep.subr.bf16.mxu0 %v2670_v54  ;;  %v118_v15 = vld [vmem:[%s3896_s2 + $0x68] sm:$0xff]  ;;  %v149_v18 = vld [vmem:[%s3896_s2 + $0x160] sm:$0xff]  ;;  %v2710_v21 = vpack.c.bf16 %v166_v12, %v165_v11  ;;  %v136_v24 = vld [vmem:[%s3896_s2 + $0xf8] sm:$0xff] }
  0x1f   :  { %2703 = vmatprep.subr.bf16.mxu1 %v2702_v58  ;;  %v69_v19 = vld [vmem:[%s3897_s4] sm:$0xff]  ;;  %v3269_v20 = vld [vmem:[%s3897_s4 + $0x8] sm:$0xff]  ;;  %v167_v25 = vld [vmem:[%s3896_s2 + $0x1f0] sm:$0xff]  ;;  %v2680_v27 = vpack.c.bf16 %v118_v15, %v117_v14  ;;  %v2682_v29 = vpack.c.bf16 %v136_v24, %v135_v23 }
  0x20   :  { %v150_v22 = vld [vmem:[%s3896_s2 + $0x168] sm:$0xff]  ;;  %71 = vst [vmem:[#allocation2 + $0x2] sm:$0xff] %v69_v19  ;;  %72 = vst [vmem:[#allocation2 + $0xa] sm:$0xff] %v3269_v20  ;;  %v168_v26 = vld [vmem:[%s3896_s2 + $0x1f8] sm:$0xff] }
  0x21   :  { %2673 = vmatpush3.bf16.msra.mxu0 %v2672_v0  ;;  %v2712_v28 = vpack.c.bf16 %v150_v22, %v149_v18  ;;  %v119_v30 = vld [vmem:[%s3896_s2 + $0x70] sm:$0xff]  ;;  %v120_v31 = vld [vmem:[%s3896_s2 + $0x78] sm:$0xff]  ;;  %v2714_v33 = vpack.c.bf16 %v168_v26, %v167_v25  ;;  %v169_v38 = vld [vmem:[%s3896_s2 + $0x200] sm:$0xff] }
  0x22   :  { %2705 = vmatpush3.bf16.msra.mxu1 %v2704_v1  ;;  %2675 = vmatprep.subr.bf16.mxu0 %v2674_v2  ;;  %v2095_v32 = vld [vmem:[%s3897_s4 + $0x10] sm:$0xff]  ;;  %v152_v35 = vld [vmem:[%s3896_s2 + $0x178] sm:$0xff]  ;;  %v2684_v37 = vpack.c.bf16 %v120_v31, %v119_v30 }
  0x23   :  { %2707 = vmatprep.subr.bf16.mxu1 %v2706_v6  ;;  %v151_v34 = vld [vmem:[%s3896_s2 + $0x170] sm:$0xff]  ;;  %78 = vst [vmem:[#allocation2 + $0x16] sm:$0xff] %v2095_v32  ;;  %v2096_v36 = vld [vmem:[%s3897_s4 + $0x18] sm:$0xff] }
  0x24   :  { %79 = vst [vmem:[#allocation2 + $0x1e] sm:$0xff] %v2096_v36 }
  0x25   :  { %2677 = vmatpush3.bf16.msra.mxu0 %v2676_v13 }
  0x26   :  { %2709 = vmatpush3.bf16.msra.mxu1 %v2708_v16  ;;  %2679 = vmatprep.subr.bf16.mxu0 %v2678_v17 }
  0x27   :  { %2711 = vmatprep.subr.bf16.mxu1 %v2710_v21 }
  0x29   :  { %2681 = vmatpush3.bf16.msra.mxu0 %v2680_v27 }
  0x2a   :  { %28 = vsyncpa [#allocation6], 0  ;;  %2713 = vmatpush3.bf16.msra.mxu1 %v2712_v28  ;;  %2683 = vmatprep.subr.bf16.mxu0 %v2682_v29  ;;  %v2716_v39 = vpack.c.bf16 %v152_v35, %v151_v34  ;;  %v85_v40 = vld [vmem:[#allocation2 + $0x1] sm:$0xff]  ;;  %v2980_v45 = vmov 0.0|0.0   ;;  %v171_v46 = vld [vmem:[%s3896_s2 + $0x210] sm:$0xff]  ;;  %vm2981_vm0 = vmmov 0  }
  0x2b   :  { %v95_v41 = vld [vmem:[#allocation2 + $0x3] sm:$0xff]  ;;  %2715 = vmatprep.subr.bf16.mxu1 %v2714_v33  ;;  %249 = vmatprep.mubr.f32.mxu0 %v85_v40  ;;  %v172_v47 = vld [vmem:[%s3896_s2 + $0x218] sm:$0xff]  ;;  %v96_v49 = vld [vmem:[#allocation2 + $0xb] sm:$0xff]  ;;  %vm459_vm1 = vcmask 293888   ;;  %vm472_vm2 = vcmask 1043456   ;;  %s3898_s22 = sld [smem:[#allocation11_spill]] }
  0x2c   :  { %v170_v42 = vld [vmem:[%s3896_s2 + $0x208] sm:$0xff]  ;;  %339 = vmatprep.mubr.f32.mxu1 %v95_v41  ;;  %v80_v43 = vld [vmem:[#allocation2] sm:$0xff]  ;;  %v2722_v50 = vpack.c.bf16 %v172_v47, %v171_v46  ;;  %v87_v54 = vld [vmem:[#allocation2 + $0x11] sm:$0xff]  ;;  %vm574_vm3 = vcmask 517120   ;;  %s3899_s28 = sld [smem:[#allocation10_spill]]  ;;  %vm577_vm4 = vcmask 523264  }
  0x2d   :  { %2685 = vmatpush3.bf16.msra.mxu0 %v2684_v37  ;;  %v2719_v44 = vpack.c.bf16 %v170_v42, %v169_v38  ;;  %v86_v48 = vld [vmem:[#allocation2 + $0x9] sm:$0xff]  ;;  %v173_v52 = vld [vmem:[%s3896_s2 + $0x220] sm:$0xff]  ;;  %v97_v55 = vld [vmem:[#allocation2 + $0x13] sm:$0xff]  ;;  %576 = vst.msk [vmem:[#allocation3 + $0xa] sm:$0x3] %vm574_vm3, %v2979_v8  ;;  %vm840_vm5 = vcmask 162816  }
  0x2e   :  { %2717 = vmatpush3.bf16.msra.mxu1 %v2716_v39  ;;  %2718 = vmatprep.subr.bf16.mxu0 %v2980_v45  ;;  %v81_v51 = vld [vmem:[#allocation2 + $0x8] sm:$0xff]  ;;  %v82_v57 = vld [vmem:[#allocation2 + $0x10] sm:$0xff]  ;;  %v176_v59 = vld [vmem:[%s3896_s2 + $0x238] sm:$0xff]  ;;  %575 = vst.msk [vmem:[#allocation3] sm:$0x3] %vm574_vm3, %v2979_v8  ;;  %s3900_s23 = sld [smem:[#allocation12_spill]] }
  0x2f   :  { %v174_v53 = vld [vmem:[%s3896_s2 + $0x228] sm:$0xff]  ;;  %v175_v58 = vld [vmem:[%s3896_s2 + $0x230] sm:$0xff]  ;;  %v88_v61 = vld [vmem:[#allocation2 + $0x19] sm:$0xff]  ;;  %579 = vst.msk [vmem:[#allocation3 + $0xc] sm:$0x3] %vm574_vm3, %v2979_v8  ;;  %vm958_vm6 = vcmask 261120  }
  0x30   :  { %250 = vmatmul.mubr.f32.vlgmr.msra.gmra.mrb[0].mxu0 %v80_v43  ;;  %v2725_v56 = vpack.c.bf16 %v174_v53, %v173_v52  ;;  %v92_v60 = vld [vmem:[#allocation2 + $0x12] sm:$0xff]  ;;  %v98_v62 = vld [vmem:[#allocation2 + $0x1b] sm:$0xff]  ;;  %v2728_v63 = vpack.c.bf16 %v176_v59, %v175_v58  ;;  %v178_v2 = vld [vmem:[%s3896_s2 + $0x248] sm:$0xff]  ;;  %580 = vst.msk [vmem:[#allocation3 + $0x16] sm:$0x3] %vm574_vm3, %v2979_v8  ;;  %vm1482_vm7 = vcmask 785408  }
  0x31   :  { %340 = vmatmul.mubr.f32.vlgmr.msra.gmra.mrb[0].mxu1 %v69_v19  ;;  %2720 = vmatpush3.bf16.msra.mxu0 %v2719_v44  ;;  %v83_v0 = vld [vmem:[#allocation2 + $0x18] sm:$0xff]  ;;  %v177_v1 = vld [vmem:[%s3896_s2 + $0x240] sm:$0xff]  ;;  %v179_v9 = vld [vmem:[%s3896_s2 + $0x250] sm:$0xff]  ;;  %vm1730_vm8 = vcmask 25600   ;;  %vm1744_vm9 = vcmask 31744   ;;  %vm1913_vm10 = vcmask 130048  }
  0x32   :  { %2721 = vmatprep.subr.bf16.mxu0 %v2980_v45  ;;  %254 = vmatprep.mubr.f32.mxu0 %v86_v48  ;;  %v93_v3 = vld [vmem:[#allocation2 + $0x1a] sm:$0xff]  ;;  %v99_v5 = vld [vmem:[#allocation2 + $0x23] sm:$0xf]  ;;  %v2731_v6 = vpack.c.bf16 %v178_v2, %v177_v1  ;;  %v182_v14 = vld [vmem:[%s3896_s2 + $0x268] sm:$0xff]  ;;  %vm1995_vm11 = vcmask 64512  }
  0x33   :  { %344 = vmatprep.mubr.f32.mxu1 %v96_v49  ;;  %v89_v4 = vld [vmem:[#allocation2 + $0x21] sm:$0xf]  ;;  %v180_v10 = vld [vmem:[%s3896_s2 + $0x258] sm:$0xff]  ;;  %v183_v16 = vld [vmem:[%s3896_s2 + $0x270] sm:$0xff] }
  0x34   :  { %255 = vmatmul.mubr.f32.gmra.mrb[2].mxu0 %v81_v51  ;;  %v84_v7 = vld [vmem:[#allocation2 + $0x20] sm:$0xf]  ;;  %v2734_v12 = vpack.c.bf16 %v180_v10, %v179_v9  ;;  %v184_v17 = vld [vmem:[%s3896_s2 + $0x278] sm:$0xff]  ;;  %v100_v19 = vld [vmem:[#allocation2 + $0x4] sm:$0xff] }
  0x35   :  { %2723 = vmatpush3.bf16.msra.mxu0 %v2722_v50  ;;  %345 = vmatmul.mubr.f32.gmra.mrb[2].mxu1 %v3269_v20  ;;  %v94_v11 = vld [vmem:[#allocation2 + $0x22] sm:$0xf]  ;;  %v2740_v18 = vpack.c.bf16 %v184_v17, %v183_v16  ;;  %v101_v20 = vld [vmem:[#allocation2 + $0xc] sm:$0xff]  ;;  %v102_v21 = vld [vmem:[#allocation2 + $0x14] sm:$0xff] }
  0x36   :  { %2724 = vmatprep.subr.bf16.mxu0 %v2980_v45  ;;  %259 = vmatprep.mubr.f32.mxu0 %v87_v54  ;;  %v181_v13 = vld [vmem:[%s3896_s2 + $0x260] sm:$0xff]  ;;  %v457_v16 = vld [vmem:[%s3879_s12 + $0x10] sm:$0xff]  ;;  %v458_v17 = vld [vmem:[%s3879_s12 + $0x18] sm:$0xff] }
  0x37   :  { %349 = vmatprep.mubr.f32.mxu1 %v97_v55  ;;  %v2737_v15 = vpack.c.bf16 %v182_v14, %v181_v13  ;;  %v103_v22 = vld [vmem:[#allocation2 + $0x1c] sm:$0xff]  ;;  %v104_v23 = vld [vmem:[#allocation2 + $0x24] sm:$0xf] }
  0x38   :  { %260 = vmatmul.mubr.f32.gmra.mrb[4].mxu0 %v82_v57  ;;  %v455_v24 = vld [vmem:[%s3879_s12] sm:$0xff] }
  0x39   :  { %2726 = vmatpush3.bf16.msra.mxu0 %v2725_v56  ;;  %350 = vmatmul.mubr.f32.gmra.mrb[4].mxu1 %v92_v60 }
  0x3a   :  { %2727 = vmatprep.subr.bf16.mxu0 %v2980_v45  ;;  %264 = vmatprep.mubr.f32.mxu0 %v88_v61 }
  0x3b   :  { %354 = vmatprep.mubr.f32.mxu1 %v98_v62 }
  0x3c   :  { %265 = vmatmul.mubr.f32.gmra.mrb[6].mxu0 %v83_v0 }
  0x3d   :  { %2729 = vmatpush3.bf16.msra.mxu0 %v2728_v63  ;;  %355 = vmatmul.mubr.f32.gmra.mrb[6].mxu1 %v93_v3 }
  0x3e   :  { %2730 = vmatprep.subr.bf16.mxu0 %v2980_v45  ;;  %269 = vmatprep.mubr.f32.mxu0 %v89_v4 }
  0x3f   :  { %359 = vmatprep.mubr.f32.mxu1 %v99_v5 }
  0x40   :  { %270 = vmatmul.mubr.f32.gmra.mrb[8].mxu0 %v84_v7 }
  0x41   :  { %2732 = vmatpush3.bf16.msra.mxu0 %v2731_v6  ;;  %360 = vmatmul.mubr.f32.gmra.mrb[8].mxu1 %v94_v11 }
  0x42   :  { %2733 = vmatprep.subr.bf16.mxu0 %v2980_v45  ;;  %2422 = vmatprep.mubr.msk.f32.mxu0 %vm2981_vm0, %v2979_v8 }
  0x43   :  { %2447 = vmatprep.mubr.msk.f32.mxu1 %vm459_vm1, %v455_v24  ;;  %v663_v24 = vld [vmem:[%s3898_s22 + $0x120] sm:$0xff] }
  0x45   :  { %2735 = vmatpush3.bf16.msra.mxu0 %v2734_v12 }
  0x46   :  { %2736 = vmatprep.subr.bf16.mxu0 %v2980_v45 }
  0x49   :  { %2738 = vmatpush3.bf16.msra.mxu0 %v2737_v15  ;;  %v456_v15 = vld [vmem:[%s3879_s12 + $0x8] sm:$0xff] }
  0x4a   :  { %2739 = vmatprep.subr.bf16.mxu0 %v2980_v45 }
  0x4d   :  { %2741 = vmatpush3.bf16.msra.mxu0 %v2740_v18  ;;  %v659_v18 = vld [vmem:[%s3898_s22 + $0x100] sm:$0xff] }
  0x4e   :  { %2782 = vmatprep.subr.bf16.mxu0 %v2980_v45 }
  0x50   :  { %2423 = vmatmul.mubr.f32.vlgmr.msra.gmra.mrb[10].mxu0 %v100_v19  ;;  %v660_v19 = vld [vmem:[%s3898_s22 + $0x108] sm:$0xff] }
  0x51   :  { %2425 = vmatprep.mubr.msk.f32.mxu0 %vm2981_vm0, %v2979_v8 }
  0x54   :  { %2426 = vmatmul.mubr.f32.gmra.mrb[12].mxu0 %v101_v20  ;;  %v2783_v20 = vpack.c.bf16 %v660_v19, %v659_v18  ;;  %v657_v19 = vld [vmem:[%s3898_s22 + $0xf0] sm:$0xff] }
  0x55   :  { %2428 = vmatprep.mubr.msk.f32.mxu0 %vm2981_vm0, %v2979_v8 }
  0x56   :  { %2784 = vmatpush3.bf16.msra.mxu0 %v2783_v20  ;;  %v658_v20 = vld [vmem:[%s3898_s22 + $0xf8] sm:$0xff] }
  0x57   :  { %2785 = vmatprep.subr.bf16.mxu0 %v2980_v45 }
  0x58   :  { %2429 = vmatmul.mubr.f32.gmra.mrb[14].mxu0 %v102_v21  ;;  %v661_v21 = vld [vmem:[%s3898_s22 + $0x110] sm:$0xff] }
  0x59   :  { %2431 = vmatprep.mubr.msk.f32.mxu0 %vm2981_vm0, %v2979_v8 }
  0x5c   :  { %2432 = vmatmul.mubr.f32.gmra.mrb[16].mxu0 %v103_v22  ;;  %v662_v22 = vld [vmem:[%s3898_s22 + $0x118] sm:$0xff] }
  0x5d   :  { %2434 = vmatprep.mubr.msk.f32.mxu0 %vm2981_vm0, %v2979_v8 }
  0x60   :  { %2435 = vmatmul.mubr.f32.gmra.mrb[18].mxu0 %v104_v23  ;;  %v2786_v23 = vpack.c.bf16 %v662_v22, %v661_v21  ;;  %v2778_v22 = vpack.c.bf16 %v658_v20, %v657_v19  ;;  %v838_v19 = vld [vmem:[%s3880_s13 + $0x10] sm:$0xff]  ;;  %v839_v20 = vld [vmem:[%s3880_s13 + $0x18] sm:$0xff] }
  0x61   :  { %2469 = vmatprep.mubr.msk.f32.mxu0 %vm2981_vm0, %v2979_v8 }
  0x62   :  { %2787 = vmatpush3.bf16.msra.mxu0 %v2786_v23  ;;  %v641_v23 = vld [vmem:[%s3898_s22 + $0x70] sm:$0xff] }
  0x63   :  { %2788 = vmatprep.subr.bf16.mxu0 %v2980_v45 }
 0x103   :  { %v2163_v25 = vpop.f32.mrb[0].mxu0 }
 0x104   :  { %v2210_v26 = vpop.f32.mrb[0].mxu1  ;;  %v2164_v27 = vpop.f32.mrb[1].mxu0 }
 0x105   :  { %v2165_v28 = vadd.f32 %v2164_v27, %v2163_v25  ;;  %v2211_v29 = vpop.f32.mrb[1].mxu1  ;;  %v664_v25 = vld [vmem:[%s3898_s22 + $0x128] sm:$0xff]  ;;  %v665_v27 = vld [vmem:[%s3898_s22 + $0x130] sm:$0xff] }
 0x106   :  { %v2212_v30 = vadd.f32 %v2211_v29, %v2210_v26  ;;  %v2789_v26 = vpack.c.bf16 %v664_v25, %v663_v24  ;;  %v642_v24 = vld [vmem:[%s3898_s22 + $0x78] sm:$0xff] }
 0x107   :  { %v2166_v31 = vpop.f32.mrb[2].mxu0 }
 0x108   :  { %v2213_v32 = vpop.f32.mrb[2].mxu1  ;;  %v2167_v33 = vpop.f32.mrb[3].mxu0  ;;  %v342_v34 = vadd.f32 %v2212_v30, %v2165_v28  ;;  %v666_v28 = vld [vmem:[%s3898_s22 + $0x138] sm:$0xff]  ;;  %2790 = vmatpush3.bf16.msra.mxu0 %v2789_v26  ;;  %v643_v30 = vld [vmem:[%s3898_s22 + $0x80] sm:$0xff]  ;;  %v2780_v26 = vpack.c.bf16 %v642_v24, %v641_v23  ;;  %v962_v23 = vld [vmem:[%s3872_s5 + $0x10] sm:$0xff] }
 0x109   :  { %v2168_v35 = vadd.f32 %v2167_v33, %v2166_v31  ;;  %v2214_v36 = vpop.f32.mrb[3].mxu1  ;;  %v2792_v29 = vpack.c.bf16 %v666_v28, %v665_v27  ;;  %2791 = vmatprep.subr.bf16.mxu0 %v2980_v45  ;;  %v644_v31 = vld [vmem:[%s3898_s22 + $0x88] sm:$0xff] }
 0x10a   :  { %v2215_v37 = vadd.f32 %v2214_v36, %v2213_v32  ;;  %v627_v32 = vld [vmem:[%s3898_s22] sm:$0xff]  ;;  %v2750_v33 = vpack.c.bf16 %v644_v31, %v643_v30  ;;  %v646_v36 = vld [vmem:[%s3898_s22 + $0x98] sm:$0xff] }
 0x10b   :  { %v2169_v38 = vpop.f32.mrb[4].mxu0 }
 0x10c   :  { %v2216_v39 = vpop.f32.mrb[4].mxu1  ;;  %v2170_v40 = vpop.f32.mrb[5].mxu0  ;;  %v347_v41 = vadd.f32 %v2215_v37, %v2168_v35  ;;  %2793 = vmatpush3.bf16.msra.mxu0 %v2792_v29  ;;  %v645_v35 = vld [vmem:[%s3898_s22 + $0x90] sm:$0xff] }
 0x10d   :  { %v2171_v42 = vadd.f32 %v2170_v40, %v2169_v38  ;;  %v2217_v43 = vpop.f32.mrb[5].mxu1  ;;  %v2754_v38 = vpack.c.bf16 %v646_v36, %v645_v35  ;;  %v630_v40 = vld [vmem:[%s3898_s22 + $0x18] sm:$0xff] }
 0x10e   :  { %v2218_v44 = vadd.f32 %v2217_v43, %v2216_v39  ;;  %v629_v39 = vld [vmem:[%s3898_s22 + $0x10] sm:$0xff] }
 0x10f   :  { %v2172_v46 = vpop.f32.mrb[6].mxu0  ;;  %v2756_v43 = vpack.c.bf16 %v630_v40, %v629_v39 }
 0x110   :  { %v2219_v47 = vpop.f32.mrb[6].mxu1  ;;  %v2173_v48 = vpop.f32.mrb[7].mxu0  ;;  %v352_v49 = vadd.f32 %v2218_v44, %v2171_v42  ;;  %v648_v42 = vld [vmem:[%s3898_s22 + $0xa8] sm:$0xff] }
 0x111   :  { %v2174_v50 = vadd.f32 %v2173_v48, %v2172_v46  ;;  %v2220_v51 = vpop.f32.mrb[7].mxu1  ;;  %v631_v46 = vld [vmem:[%s3898_s22 + $0x20] sm:$0xff]  ;;  %v649_v48 = vld [vmem:[%s3898_s22 + $0xb0] sm:$0xff] }
 0x112   :  { %v2221_v52 = vadd.f32 %v2220_v51, %v2219_v47  ;;  %v632_v47 = vld [vmem:[%s3898_s22 + $0x28] sm:$0xff] }
 0x113   :  { %v2175_v53 = vpop.f32.mrb[8].mxu0 }
 0x114   :  { %v2222_v54 = vpop.f32.mrb[8].mxu1  ;;  %v2176_v55 = vpop.f32.mrb[9].mxu0  ;;  %v357_v56 = vadd.f32 %v2221_v52, %v2174_v50  ;;  %v2760_v50 = vpack.c.bf16 %v632_v47, %v631_v46  ;;  %v633_v52 = vld [vmem:[%s3898_s22 + $0x30] sm:$0xff] }
 0x115   :  { %v2177_v57 = vadd.f32 %v2176_v55, %v2175_v53  ;;  %v2223_v58 = vpop.f32.mrb[9].mxu1  ;;  %v634_v53 = vld [vmem:[%s3898_s22 + $0x38] sm:$0xff]  ;;  %v652_v55 = vld [vmem:[%s3898_s22 + $0xc8] sm:$0xff] }
 0x116   :  { %v2224_v59 = vadd.f32 %v2223_v58, %v2222_v54  ;;  %v651_v54 = vld [vmem:[%s3898_s22 + $0xc0] sm:$0xff] }
 0x117   :  { %v635_v58 = vld [vmem:[%s3898_s22 + $0x40] sm:$0xff] }
 0x118   :  { %v362_v60 = vadd.f32 %v2224_v59, %v2177_v57  ;;  %v2766_v57 = vpack.c.bf16 %v652_v55, %v651_v54  ;;  %v636_v59 = vld [vmem:[%s3898_s22 + $0x48] sm:$0xff] }
 0x123   :  { %v431_v61 = vpop.f32.mrb[10].mxu0 }
 0x124   :  { %v432_v62 = vadd.f32 %v431_v61, %v342_v34  ;;  %v2424_v63 = vpop.f32.mrb[11].mxu0  ;;  %v628_v34 = vld [vmem:[%s3898_s22 + $0x8] sm:$0xff]  ;;  %v654_v61 = vld [vmem:[%s3898_s22 + $0xd8] sm:$0xff] }
 0x125   :  { %v2752_v37 = vpack.c.bf16 %v628_v34, %v627_v32 }
 0x127   :  { %v436_v0 = vpop.f32.mrb[12].mxu0 }
 0x128   :  { %v437_v1 = vadd.f32 %v436_v0, %v347_v41  ;;  %v2427_v2 = vpop.f32.mrb[13].mxu0  ;;  %v647_v41 = vld [vmem:[%s3898_s22 + $0xa0] sm:$0xff]  ;;  %v637_v0 = vld [vmem:[%s3898_s22 + $0x50] sm:$0xff] }
 0x129   :  { %v2758_v44 = vpack.c.bf16 %v648_v42, %v647_v41  ;;  %v655_v2 = vld [vmem:[%s3898_s22 + $0xe0] sm:$0xff] }
 0x12a   :  { %v2742_v3 = vpack.c.bf16 %v437_v1, %v432_v62  ;;  %v2768_v62 = vpack.c.bf16 %v636_v59, %v635_v58  ;;  %v638_v1 = vld [vmem:[%s3898_s22 + $0x58] sm:$0xff] }
 0x12b   :  { %v441_v4 = vpop.f32.mrb[14].mxu0 }
 0x12c   :  { %v442_v5 = vadd.f32 %v441_v4, %v352_v49  ;;  %v2430_v6 = vpop.f32.mrb[15].mxu0  ;;  %2743 = vmatprep.subr.bf16.mxu1 %v2742_v3  ;;  %v650_v49 = vld [vmem:[%s3898_s22 + $0xb8] sm:$0xff]  ;;  %v2772_v4 = vpack.c.bf16 %v638_v1, %v637_v0 }
 0x12d   :  { %2745 = vmatpush3.bf16.msra.mxu1 %v2742_v3  ;;  %v2762_v51 = vpack.c.bf16 %v650_v49, %v649_v48  ;;  %v656_v3 = vld [vmem:[%s3898_s22 + $0xe8] sm:$0xff]  ;;  %v639_v6 = vld [vmem:[%s3898_s22 + $0x60] sm:$0xff] }
 0x12f   :  { %v446_v7 = vpop.f32.mrb[16].mxu0 }
 0x130   :  { %v447_v9 = vadd.f32 %v446_v7, %v357_v56  ;;  %v2433_v10 = vpop.f32.mrb[17].mxu0  ;;  %v2764_v56 = vpack.c.bf16 %v634_v53, %v633_v52  ;;  %v640_v7 = vld [vmem:[%s3898_s22 + $0x68] sm:$0xff] }
 0x132   :  { %v2746_v11 = vpack.c.bf16 %v447_v9, %v442_v5  ;;  %v2774_v5 = vpack.c.bf16 %v656_v3, %v655_v2  ;;  %v2776_v9 = vpack.c.bf16 %v640_v7, %v639_v6  ;;  %v836_v3 = vld [vmem:[%s3880_s13] sm:$0xff] }
 0x133   :  { %v451_v12 = vpop.f32.mrb[18].mxu0 }
 0x134   :  { %v452_v13 = vadd.f32 %v451_v12, %v362_v60  ;;  %2747 = vmatprep.subr.bf16.mxu1 %v2746_v11  ;;  %v2436_v14 = vpop.f32.mrb[19].mxu0  ;;  %v653_v60 = vld [vmem:[%s3898_s22 + $0xd0] sm:$0xff]  ;;  %s2982_s22 = smov 64  }
 0x135   :  { %2749 = vmatpush3.bf16.msra.mxu1 %v2746_v11  ;;  %v2770_v63 = vpack.c.bf16 %v654_v61, %v653_v60 }
 0x136   :  { %2445 = vmatprep.subr.msk.mxu1 %vm472_vm2, %v452_v13 }
 0x139   :  { %2446 = vmatpush3.msk.msra.mxu1 %vm472_vm2, %v452_v13  ;;  %v2102_v13 = vld [vmem:[%s3899_s28] ss:$0 sm:$0xff] }
 0x13a   :  { %2448 = vmatmul.mubr.msk.f32.vlgmr.msra.gmra.mrb[10].mxu1 %vm459_vm1, %v456_v15  ;;  %2751 = vmatprep.subr.bf16.mxu1 %v2750_v33 }
 0x13b   :  { %2450 = vmatprep.mubr.msk.f32.mxu1 %vm459_vm1, %v457_v16  ;;  %2753 = vmatpush3.bf16.msra.mxu1 %v2752_v37 }
 0x13c   :  { %2755 = vmatprep.subr.bf16.mxu1 %v2754_v38 }
 0x13e   :  { %2451 = vmatmul.mubr.msk.f32.gmra.mrb[12].mxu1 %vm459_vm1, %v458_v17 }
 0x13f   :  { %2757 = vmatpush3.bf16.msra.mxu1 %v2756_v43 }
 0x140   :  { %2759 = vmatprep.subr.bf16.mxu1 %v2758_v44 }
 0x143   :  { %2761 = vmatpush3.bf16.msra.mxu1 %v2760_v50 }
 0x144   :  { %2763 = vmatprep.subr.bf16.mxu1 %v2762_v51 }
 0x147   :  { %2765 = vmatpush3.bf16.msra.mxu1 %v2764_v56 }
 0x148   :  { %2767 = vmatprep.subr.bf16.mxu1 %v2766_v57 }
 0x14b   :  { %2769 = vmatpush3.bf16.msra.mxu1 %v2768_v62 }
 0x14c   :  { %2771 = vmatprep.subr.bf16.mxu1 %v2770_v63 }
 0x14f   :  { %2773 = vmatpush3.bf16.msra.mxu1 %v2772_v4 }
 0x150   :  { %2775 = vmatprep.subr.bf16.mxu1 %v2774_v5 }
 0x153   :  { %2777 = vmatpush3.bf16.msra.mxu1 %v2776_v9 }
 0x154   :  { %2779 = vmatprep.subr.bf16.mxu1 %v2778_v22  ;;  %v961_v22 = vld [vmem:[%s3872_s5 + $0x8] sm:$0xff] }
 0x157   :  { %2781 = vmatpush3.bf16.msra.mxu1 %v2780_v26  ;;  %v1048_v26 = vld [vmem:[%s3874_s7] sm:$0xff] }
 0x158   :  { %2798 = vmatprep.subr.bf16.mxu1 %v2980_v45 }
 0x20d   :  { %v2449_v10 = vpop.f32.mrb[10].mxu1 }
 0x20e   :  { %v542_v11 = vpop.f32.mrb[11].mxu1 }
 0x211   :  { %v2452_v12 = vpop.f32.mrb[12].mxu1 }
 0x212   :  { %v562_v14 = vmax.f32 %v2449_v10, %v2452_v12  ;;  %v552_v15 = vpop.f32.mrb[13].mxu1 }
 0x213   :  { %v561_v16 = vmax.f32 %v542_v11, %v552_v15 }
 0x214   :  { %v571_v17 = vadd.f32 %v2102_v13, %v562_v14 }
 0x215   :  { %v570_v18 = vadd.f32 %v2102_v13, %v561_v16 }
 0x216   :  { %v573_v21 = vmax.f32 %v571_v17, 0.0 }
 0x217   :  { %v572_v25 = vmax.f32 %v570_v18, 0.0  ;;  %v837_v18 = vld [vmem:[%s3880_s13 + $0x8] sm:$0xff] }
 0x218   :  { %581 = vst.msk [vmem:[#allocation3 + $0xe] sm:$0xff] %vm577_vm4, %v573_v21  ;;  %v960_v21 = vld [vmem:[%s3872_s5] sm:$0xff] }
 0x219   :  { %578 = vst.msk [vmem:[#allocation3 + $0x2] sm:$0xff] %vm577_vm4, %v572_v25  ;;  %v2799_v24 = vpack.c.bf16 %v961_v22, %v960_v21  ;;  %v963_v25 = vld [vmem:[%s3872_s5 + $0x18] sm:$0xff] }
 0x21f   :  { %v587_v27 = vld [vmem:[#allocation3 + $0x11] sm:$0xf] }
 0x220   :  { %v593_v28 = vld [vmem:[#allocation3 + $0x13] sm:$0xf]  ;;  %v594_v29 = vld [vmem:[#allocation3 + $0x4] sm:$0xff] }
 0x221   :  { %v2908_v30 = vpack.i.bf16 %v587_v27, %v593_v28  ;;  %v585_v31 = vld [vmem:[#allocation3 + $0x1] sm:$0xff]  ;;  %2470 = vmatmul.mubr.msk.f32.vlgmr.msra.gmra.mrb[20].mxu0 %vm577_vm4, %v594_v29  ;;  %v586_v34 = vld [vmem:[#allocation3 + $0x9] sm:$0xff]  ;;  %v596_v38 = vld [vmem:[#allocation3 + $0x14] sm:$0xf]  ;;  %v2802_v28 = vpack.c.bf16 %v963_v25, %v962_v23 }
 0x222   :  { %v591_v32 = vld [vmem:[#allocation3 + $0x3] sm:$0xff]  ;;  %2472 = vmatprep.mubr.msk.f32.mxu0 %vm2981_vm0, %v2979_v8  ;;  %v592_v35 = vld [vmem:[#allocation3 + $0xb] sm:$0xff] }
 0x223   :  { %v2898_v33 = vpack.i.bf16 %v585_v31, %v591_v32  ;;  %2909 = vrot.lane.b32.xlu1 %v2908_v30, %s2982_s22  ;;  %v595_v36 = vld [vmem:[#allocation3 + $0xc] sm:$0xff]  ;;  %v2903_v37 = vpack.i.bf16 %v586_v34, %v592_v35  ;;  %v588_v43 = vld [vmem:[#allocation3 + $0x2] sm:$0xff]  ;;  %v964_v30 = vld [vmem:[%s3872_s5 + $0x20] sm:$0xff] }
 0x224   :  { %v582_v44 = vld [vmem:[#allocation3] sm:$0xff]  ;;  %v589_v52 = vld [vmem:[#allocation3 + $0xa] sm:$0xff]  ;;  %v590_v57 = vld [vmem:[#allocation3 + $0x12] sm:$0xf] }
 0x225   :  { %2899 = vrot.lane.b32.xlu0 %v2898_v33, %s2982_s22  ;;  %2473 = vmatmul.mubr.msk.f32.gmra.mrb[22].mxu0 %vm577_vm4, %v595_v36  ;;  %v583_v53 = vld [vmem:[#allocation3 + $0x8] sm:$0xff]  ;;  %v584_v59 = vld [vmem:[#allocation3 + $0x10] sm:$0xf]  ;;  %v1049_v27 = vld [vmem:[%s3874_s7 + $0x8] sm:$0xff] }
 0x226   :  { %2475 = vmatprep.mubr.msk.f32.mxu0 %vm2981_vm0, %v2979_v8  ;;  %v3583_v29 = vpack.c.bf16 %v1049_v27, %v1048_v26  ;;  %v965_v31 = vld [vmem:[%s3872_s5 + $0x28] sm:$0xff]  ;;  %v966_v33 = vld [vmem:[%s3872_s5 + $0x30] sm:$0xff]  ;;  %v967_v34 = vld [vmem:[%s3872_s5 + $0x38] sm:$0xff]  ;;  %s2985_s5 = smov [#allocation5]  }
 0x227   :  { %v2805_v32 = vpack.c.bf16 %v965_v31, %v964_v30  ;;  %v2808_v35 = vpack.c.bf16 %v967_v34, %v966_v33  ;;  %v1050_v36 = vld [vmem:[%s3874_s7 + $0x10] sm:$0xff] }
 0x229   :  { %2904 = vrot.lane.b32.xlu0 %v2903_v37, %s2982_s22  ;;  %2476 = vmatmul.mubr.msk.f32.gmra.mrb[24].mxu0 %vm577_vm4, %v596_v38  ;;  %v1051_v37 = vld [vmem:[%s3874_s7 + $0x18] sm:$0xff]  ;;  %s2983_s7 = smov 32  }
 0x22a   :  { %2484 = vmatprep.mubr.msk.f32.mxu0 %vm840_vm5, %v836_v3  ;;  %v3609_v38 = vpack.c.bf16 %v1051_v37, %v1050_v36 }
 0x295   :  { %v2910_v42 = vpop.permute.xlu1 %2909 }
 0x296   :  { %v2911_v49 = vunpack.i.l.bf16 %v2910_v42  ;;  %v2912_v56 = vunpack.i.h.bf16 %v2910_v42  ;;  %v2111_v42 = vld [vmem:[%s3900_s23] ss:$0 sm:$0xff] }
 0x297   :  { %v2900_v39 = vpop.permute.xlu0 %2899 }
 0x298   :  { %v2902_v40 = vunpack.i.h.bf16 %v2900_v39  ;;  %v2901_v41 = vunpack.i.l.bf16 %v2900_v39  ;;  %v626_v58 = vsel %vm577_vm4, %v590_v57, %v2911_v49  ;;  %v623_v60 = vsel %vm577_vm4, %v584_v59, %v2912_v56 }
 0x29a   :  { %v624_v46 = vsel %vm577_vm4, %v588_v43, %v2901_v41  ;;  %v621_v47 = vsel %vm577_vm4, %v582_v44, %v2902_v40 }
 0x29b   :  { %v2905_v48 = vpop.permute.xlu0 %2904  ;;  %740 = vmatprep.mubr.f32.mxu1 %v624_v46 }
 0x29c   :  { %v2907_v50 = vunpack.i.h.bf16 %v2905_v48  ;;  %v2906_v51 = vunpack.i.l.bf16 %v2905_v48  ;;  %741 = vmatmul.mubr.f32.vlgmr.msra.gmra.mrb[14].mxu1 %v621_v47 }
 0x29d   :  { %2800 = vmatpush3.bf16.msra.mxu1 %v2799_v24 }
 0x29e   :  { %v625_v54 = vsel %vm577_vm4, %v589_v52, %v2906_v51  ;;  %v622_v55 = vsel %vm577_vm4, %v583_v53, %v2907_v50  ;;  %2801 = vmatprep.subr.bf16.mxu1 %v2980_v45 }
 0x29f   :  { %745 = vmatprep.mubr.f32.mxu1 %v625_v54 }
 0x2a0   :  { %746 = vmatmul.mubr.f32.gmra.mrb[16].mxu1 %v622_v55  ;;  %v2112_v55 = vld [vmem:[%s3873_s6] ss:$0 sm:$0xff] }
 0x2a1   :  { %750 = vmatprep.mubr.f32.mxu1 %v626_v58  ;;  %2803 = vmatpush3.bf16.msra.mxu1 %v2802_v28 }
 0x2a2   :  { %2804 = vmatprep.subr.bf16.mxu1 %v2980_v45 }
 0x2a4   :  { %751 = vmatmul.mubr.f32.gmra.mrb[18].mxu1 %v623_v60 }
 0x2a5   :  { %2506 = vmatprep.mubr.msk.f32.mxu1 %vm2981_vm0, %v2979_v8  ;;  %2806 = vmatpush3.bf16.msra.mxu1 %v2805_v32 }
 0x2a6   :  { %2807 = vmatprep.subr.bf16.mxu1 %v2980_v45 }
 0x2a9   :  { %2809 = vmatpush3.bf16.msra.mxu1 %v2808_v35 }
 0x2aa   :  { %2816 = vmatprep.subr.bf16.mxu1 %v2980_v45 }
 0x2f4   :  { %v822_v61 = vpop.f32.mrb[20].mxu0 }
 0x2f5   :  { %v2471_v62 = vpop.f32.mrb[21].mxu0 }
 0x2f8   :  { %v827_v63 = vpop.f32.mrb[22].mxu0 }
 0x2f9   :  { %v2474_v0 = vpop.f32.mrb[23].mxu0 }
 0x2fc   :  { %v832_v1 = vpop.f32.mrb[24].mxu0 }
 0x2fd   :  { %v2477_v2 = vpop.f32.mrb[25].mxu0 }
 0x36f   :  { %v2287_v4 = vpop.f32.mrb[14].mxu1 }
 0x370   :  { %v2288_v5 = vpop.f32.mrb[15].mxu1 }
 0x371   :  { %v2289_v6 = vadd.f32 %v2288_v5, %v2287_v4 }
 0x373   :  { %v823_v7 = vadd.f32 %v2289_v6, %v822_v61  ;;  %v2290_v9 = vpop.f32.mrb[16].mxu1 }
 0x374   :  { %v2291_v10 = vpop.f32.mrb[17].mxu1 }
 0x375   :  { %v2292_v11 = vadd.f32 %v2291_v10, %v2290_v9 }
 0x377   :  { %v828_v12 = vadd.f32 %v2292_v11, %v827_v63  ;;  %v2293_v13 = vpop.f32.mrb[18].mxu1 }
 0x378   :  { %v2294_v14 = vpop.f32.mrb[19].mxu1 }
 0x379   :  { %v2295_v15 = vadd.f32 %v2294_v14, %v2293_v13  ;;  %v2794_v16 = vpack.c.bf16 %v828_v12, %v823_v7 }
 0x37b   :  { %v833_v17 = vadd.f32 %v2295_v15, %v832_v1  ;;  %2795 = vmatprep.subr.bf16.mxu0 %v2794_v16 }
 0x37c   :  { %2797 = vmatpush3.bf16.msra.mxu0 %v2794_v16 }
 0x37d   :  { %2482 = vmatprep.subr.msk.mxu0 %vm472_vm2, %v833_v17 }
 0x380   :  { %2483 = vmatpush3.msk.msra.mxu0 %vm472_vm2, %v833_v17 }
 0x381   :  { %2485 = vmatmul.mubr.msk.f32.vlgmr.msra.gmra.mrb[26].mxu0 %vm840_vm5, %v837_v18  ;;  %2810 = vmatprep.subr.bf16.mxu0 %v2980_v45 }
 0x382   :  { %2487 = vmatprep.mubr.msk.f32.mxu0 %vm840_vm5, %v838_v19  ;;  %2812 = vmatpush3.bf16.msra.mxu0 %v3583_v29 }
 0x383   :  { %2813 = vmatprep.subr.bf16.mxu0 %v2980_v45 }
 0x385   :  { %2488 = vmatmul.mubr.msk.f32.gmra.mrb[28].mxu0 %vm840_vm5, %v839_v20 }
 0x386   :  { %2517 = vmatprep.mubr.msk.f32.mxu0 %vm2981_vm0, %v2979_v8  ;;  %2815 = vmatpush3.bf16.msra.mxu0 %v3609_v38 }
 0x387   :  { %2822 = vmatprep.subr.bf16.mxu0 %v2980_v45 }
 0x389   :  { %2518 = vmatmul.mubr.f32.vlgmr.msra.gmra.mrb[30].mxu0 %v2979_v8 }
 0x38a   :  { %2824 = vmatpush3.bf16.msra.mxu0 %v3583_v29  ;;  %2539 = vmatprep.mubr.msk.f32.mxu0 %vm2981_vm0, %v2979_v8 }
 0x38b   :  { %2825 = vmatprep.subr.bf16.mxu0 %v2980_v45 }
 0x38e   :  { %2827 = vmatpush3.bf16.msra.mxu0 %v3609_v38 }
 0x38f   :  { %2834 = vmatprep.subr.bf16.mxu0 %v2980_v45 }
 0x454   :  { %v2486_v39 = vpop.f32.mrb[26].mxu0 }
 0x455   :  { %v922_v40 = vpop.f32.mrb[27].mxu0 }
 0x458   :  { %v2489_v41 = vpop.f32.mrb[28].mxu0 }
 0x459   :  { %v942_v43 = vmax.f32 %v2486_v39, %v2489_v41  ;;  %v932_v44 = vpop.f32.mrb[29].mxu0 }
 0x45a   :  { %v941_v46 = vmax.f32 %v922_v40, %v932_v44 }
 0x45b   :  { %v951_v47 = vadd.f32 %v2111_v42, %v942_v43 }
 0x45c   :  { %v950_v48 = vadd.f32 %v2111_v42, %v941_v46  ;;  %v1121_v53 = vpop.f32.mrb[30].mxu0 }
 0x45d   :  { %v953_v49 = vmax.f32 %v951_v47, 0.0  ;;  %v2519_v54 = vpop.f32.mrb[31].mxu0 }
 0x45e   :  { %v952_v50 = vmax.f32 %v950_v48, 0.0 }
 0x45f   :  { %955 = vrot.lane.b32.xlu1 %v953_v49, %s2983_s7 }
 0x4d1   :  { %v956_v51 = vpop.permute.xlu1 %955 }
 0x4d2   :  { %v959_v52 = vsel %vm958_vm6, %v952_v50, %v956_v51 }
 0x4d3   :  { %2507 = vmatmul.mubr.msk.f32.vlgmr.msra.gmra.mrb[20].mxu1 %vm577_vm4, %v959_v52 }
 0x4d4   :  { %2818 = vmatpush3.bf16.msra.mxu1 %v3583_v29  ;;  %2528 = vmatprep.mubr.msk.f32.mxu1 %vm2981_vm0, %v2979_v8 }
 0x4d5   :  { %2819 = vmatprep.subr.bf16.mxu1 %v2980_v45 }
 0x4d8   :  { %2821 = vmatpush3.bf16.msra.mxu1 %v3609_v38 }
 0x4d9   :  { %2828 = vmatprep.subr.bf16.mxu1 %v2980_v45 }
 0x5a6   :  { %v1044_v56 = vpop.f32.mrb[20].mxu1 }
 0x5a7   :  { %v3635_v57 = vadd.f32 %v2112_v55, %v1044_v56  ;;  %v2508_v58 = vpop.f32.mrb[21].mxu1 }
 0x5a9   :  { %v1125_v59 = vadd.f32 %v1121_v53, %v3635_v57 }
 0x5ab   :  { %2913 = vtanh.f32 %v1125_v59  ;;  %v2114_v61 = vmul.f32 -1.442695, %v1125_v59 }
 0x5ad   :  { %2915 = vpow2.f32 %v2114_v61 }
 0x5b5   :  { %v2914_v60 = vpop.eup %2913 }
 0x5b6   :  { %1135 = vrot.lane.b32.xlu0 %v2914_v60, %s2982_s22 }
 0x5b7   :  { %v2916_v62 = vpop.eup %2915 }
 0x5b8   :  { %v1129_v63 = vadd.f32 1.0, %v2916_v62 }
 0x5ba   :  { %2917 = vrcp.f32 %v1129_v63 }
 0x5c4   :  { %v2918_v0 = vpop.eup %2917 }
 0x5c5   :  { %v1133_v3 = vmul.f32 0.0, %v2918_v0 }
 0x628   :  { %v1136_v1 = vpop.permute.xlu0 %1135 }
 0x629   :  { %v1138_v2 = vmul.f32 %v2918_v0, %v1136_v1  ;;  %v1486_v1 = vld [vmem:[%s3881_s14 + $0x10] sm:$0xff] }
 0x62b   :  { %1140 = vrot.lane.b32.xlu1 %v1138_v2, %s2983_s7 }
 0x69d   :  { %v1141_v4 = vpop.permute.xlu1 %1140 }
 0x69e   :  { %v1143_v5 = vadd.f32 %v1141_v4, %v1133_v3  ;;  %v1487_v3 = vld [vmem:[%s3881_s14 + $0x18] sm:$0xff] }
 0x69f   :  { %v2838_v4 = vpack.c.bf16 %v1487_v3, %v1486_v1 }
 0x6a0   :  { %2919 = vtanh.f32 %v1143_v5  ;;  %v1237_v22 = vrot.slane %v1143_v5, 6  ;;  %v1488_v5 = vld [vmem:[%s3881_s14 + $0x20] sm:$0xff] }
 0x6aa   :  { %v2920_v6 = vpop.eup %2919 }
 0x6ab   :  { %1146 = vrot.lane.b32.xlu0 %v2920_v6, %s2982_s22  ;;  %v1489_v6 = vld [vmem:[%s3881_s14 + $0x28] sm:$0xff] }
 0x71d   :  { %v1147_v7 = vpop.permute.xlu0 %1146 }
 0x71e   :  { %v1149_v9 = vmul.f32 %v2918_v0, %v1147_v7  ;;  %v1485_v0 = vld [vmem:[%s3881_s14 + $0x8] sm:$0xff]  ;;  %v2841_v7 = vpack.c.bf16 %v1489_v6, %v1488_v5  ;;  %v1743_v6 = vld [vmem:[%s3884_s17] sm:$0xf] }
 0x720   :  { %1151 = vrot.lane.b32.xlu1 %v1149_v9, %s2983_s7  ;;  %v1490_v9 = vld [vmem:[%s3881_s14 + $0x30] sm:$0xff] }
 0x792   :  { %v3642_v10 = vpop.permute.xlu1 %1151 }
 0x793   :  { %2529 = vmatmul.mubr.msk.f32.vlgmr.msra.gmra.mrb[22].mxu1 %vm958_vm6, %v3642_v10 }
 0x794   :  { %2830 = vmatpush3.bf16.msra.mxu1 %v3583_v29  ;;  %2550 = vmatprep.mubr.msk.f32.mxu1 %vm2981_vm0, %v2979_v8 }
 0x795   :  { %2831 = vmatprep.subr.bf16.mxu1 %v2980_v45 }
 0x798   :  { %2833 = vmatpush3.bf16.msra.mxu1 %v3609_v38 }
 0x799   :  { %2858 = vmatprep.subr.bf16.mxu1 %v2980_v45 }
 0x866   :  { %v1221_v11 = vpop.f32.mrb[22].mxu1 }
 0x867   :  { %v1226_v12 = vrot.slane %v1221_v11, 6  ;;  %v2530_v13 = vpop.f32.mrb[23].mxu1  ;;  %v1491_v11 = vld [vmem:[%s3881_s14 + $0x38] sm:$0xff] }
 0x868   :  { %v1492_v13 = vld [vmem:[%s3881_s14 + $0x40] sm:$0xff] }
 0x869   :  { %v1228_v14 = vadd.f32 %v1226_v12, %v3635_v57  ;;  %v2844_v12 = vpack.c.bf16 %v1491_v11, %v1490_v9  ;;  %v1823_v9 = vld [vmem:[%s3885_s18 + $0x8] sm:$0xff] }
 0x86b   :  { %2921 = vtanh.f32 %v1228_v14  ;;  %v2116_v16 = vmul.f32 -1.442695, %v1228_v14  ;;  %v1493_v14 = vld [vmem:[%s3881_s14 + $0x48] sm:$0xff] }
 0x86d   :  { %2923 = vpow2.f32 %v2116_v16  ;;  %v1494_v16 = vld [vmem:[%s3881_s14 + $0x50] sm:$0xff] }
 0x875   :  { %v2922_v15 = vpop.eup %2921 }
 0x876   :  { %1241 = vrot.lane.b32.xlu0 %v2922_v15, %s2982_s22  ;;  %v2847_v15 = vpack.c.bf16 %v1493_v14, %v1492_v13  ;;  %v1825_v13 = vld [vmem:[%s3885_s18 + $0x18] sm:$0xff] }
 0x877   :  { %v2924_v17 = vpop.eup %2923 }
 0x878   :  { %v1232_v18 = vadd.f32 1.0, %v2924_v17  ;;  %v1495_v17 = vld [vmem:[%s3881_s14 + $0x58] sm:$0xff] }
 0x87a   :  { %2925 = vrcp.f32 %v1232_v18  ;;  %v2850_v18 = vpack.c.bf16 %v1495_v17, %v1494_v16  ;;  %v1827_v16 = vld [vmem:[%s3885_s18 + $0x28] sm:$0xff] }
 0x884   :  { %v2926_v19 = vpop.eup %2925 }
 0x885   :  { %v1239_v23 = vmul.f32 %v2926_v19, %v1237_v22 }
 0x8e8   :  { %v1242_v20 = vpop.permute.xlu0 %1241 }
 0x8e9   :  { %v1244_v21 = vmul.f32 %v2926_v19, %v1242_v20  ;;  %v1497_v20 = vld [vmem:[%s3881_s14 + $0x68] sm:$0xff] }
 0x8eb   :  { %1246 = vrot.lane.b32.xlu1 %v1244_v21, %s2983_s7 }
 0x95d   :  { %v1247_v24 = vpop.permute.xlu1 %1246 }
 0x95e   :  { %v1249_v25 = vadd.f32 %v1247_v24, %v1239_v23 }
 0x960   :  { %2927 = vtanh.f32 %v1249_v25  ;;  %v1344_v42 = vrot.slane %v1249_v25, 6 }
 0x96a   :  { %v2928_v26 = vpop.eup %2927 }
 0x96b   :  { %1252 = vrot.lane.b32.xlu0 %v2928_v26, %s2982_s22  ;;  %v1498_v26 = vld [vmem:[%s3881_s14 + $0x70] sm:$0xff] }
 0x9dd   :  { %v1253_v27 = vpop.permute.xlu0 %1252 }
 0x9de   :  { %v1255_v28 = vmul.f32 %v2926_v19, %v1253_v27  ;;  %v1496_v19 = vld [vmem:[%s3881_s14 + $0x60] sm:$0xff]  ;;  %v1499_v27 = vld [vmem:[%s3881_s14 + $0x78] sm:$0xff] }
 0x9df   :  { %v2853_v21 = vpack.c.bf16 %v1497_v20, %v1496_v19 }
 0x9e0   :  { %v1257_v29 = vrot.slane %v1255_v28, 2  ;;  %v2856_v28 = vpack.c.bf16 %v1499_v27, %v1498_v26  ;;  %v1904_v26 = vld [vmem:[%s3875_s8] sm:$0xff]  ;;  %v1905_v27 = vld [vmem:[%s3875_s8 + $0x8] sm:$0xff] }
 0x9e2   :  { %1258 = vrot.lane.b32.xlu1 %v1257_v29, %s2983_s7 }
 0xa54   :  { %v1259_v30 = vpop.permute.xlu1 %1258 }
 0xa55   :  { %2540 = vmatmul.mubr.msk.f32.vlgmr.msra.gmra.mrb[32].mxu0 %vm958_vm6, %v1259_v30  ;;  %v1571_v30 = vld [vmem:[%s3882_s15 + $0x8] sm:$0xff] }
 0xa56   :  { %2585 = vmatprep.mubr.msk.f32.mxu0 %vm2981_vm0, %v2979_v8 }
 0xb28   :  { %v1328_v31 = vpop.f32.mrb[32].mxu0 }
 0xb29   :  { %v1333_v32 = vrot.slane %v1328_v31, 4  ;;  %v2541_v33 = vpop.f32.mrb[33].mxu0  ;;  %v1572_v31 = vld [vmem:[%s3882_s15 + $0x10] sm:$0xff] }
 0xb2a   :  { %v1573_v33 = vld [vmem:[%s3882_s15 + $0x18] sm:$0xff] }
 0xb2b   :  { %v1335_v34 = vadd.f32 %v1333_v32, %v3635_v57 }
 0xb2d   :  { %2929 = vtanh.f32 %v1335_v34  ;;  %v2118_v36 = vmul.f32 -1.442695, %v1335_v34  ;;  %v2862_v34 = vpack.c.bf16 %v1573_v33, %v1572_v31  ;;  %v2126_v33 = vld [vmem:[%s3876_s9] ss:$0 sm:$0xff] }
 0xb2f   :  { %2931 = vpow2.f32 %v2118_v36 }
 0xb37   :  { %v2930_v35 = vpop.eup %2929 }
 0xb38   :  { %1348 = vrot.lane.b32.xlu0 %v2930_v35, %s2982_s22 }
 0xb39   :  { %v2932_v37 = vpop.eup %2931 }
 0xb3a   :  { %v1339_v38 = vadd.f32 1.0, %v2932_v37 }
 0xb3c   :  { %2933 = vrcp.f32 %v1339_v38 }
 0xb46   :  { %v2934_v39 = vpop.eup %2933 }
 0xb47   :  { %v1346_v43 = vmul.f32 %v2934_v39, %v1344_v42 }
 0xbaa   :  { %v1349_v40 = vpop.permute.xlu0 %1348 }
 0xbab   :  { %v1351_v41 = vmul.f32 %v2934_v39, %v1349_v40 }
 0xbad   :  { %1353 = vrot.lane.b32.xlu1 %v1351_v41, %s2983_s7 }
 0xc1f   :  { %v1354_v44 = vpop.permute.xlu1 %1353 }
 0xc20   :  { %v3663_v46 = vadd.f32 %v1354_v44, %v1346_v43  ;;  %v1649_v44 = vld [vmem:[%s3883_s16] sm:$0xff] }
 0xc22   :  { %2935 = vtanh.f32 %v3663_v46  ;;  %v1451_v22 = vrot.slane %v3663_v46, 6  ;;  %v1650_v46 = vld [vmem:[%s3883_s16 + $0x8] sm:$0xff] }
 0xc2c   :  { %v2936_v47 = vpop.eup %2935 }
 0xc2d   :  { %1359 = vrot.lane.b32.xlu0 %v2936_v47, %s2982_s22  ;;  %v2865_v47 = vpack.c.bf16 %v1650_v46, %v1649_v44 }
 0xc9f   :  { %v1360_v48 = vpop.permute.xlu0 %1359 }
 0xca0   :  { %v3667_v49 = vmul.f32 %v2934_v39, %v1360_v48  ;;  %v1652_v48 = vld [vmem:[%s3883_s16 + $0x18] sm:$0xff] }
 0xca2   :  { %v1364_v50 = vrot.slane %v3667_v49, 4 }
 0xca4   :  { %1365 = vrot.lane.b32.xlu1 %v1364_v50, %s2983_s7 }
 0xd16   :  { %v1366_v51 = vpop.permute.xlu1 %1365 }
 0xd17   :  { %2551 = vmatmul.mubr.msk.f32.vlgmr.msra.gmra.mrb[24].mxu1 %vm958_vm6, %v1366_v51  ;;  %v1653_v51 = vld [vmem:[%s3883_s16 + $0x20] sm:$0xff] }
 0xd18   :  { %2596 = vmatprep.mubr.msk.f32.mxu1 %vm2981_vm0, %v2979_v8 }
 0xdea   :  { %v1435_v52 = vpop.f32.mrb[24].mxu1 }
 0xdeb   :  { %v1440_v53 = vrot.slane %v1435_v52, 2  ;;  %v2552_v54 = vpop.f32.mrb[25].mxu1  ;;  %v1654_v52 = vld [vmem:[%s3883_s16 + $0x28] sm:$0xff] }
 0xdec   :  { %v1655_v54 = vld [vmem:[%s3883_s16 + $0x30] sm:$0xff] }
 0xded   :  { %v1442_v55 = vadd.f32 %v1440_v53, %v3635_v57  ;;  %v1484_v57 = vld [vmem:[%s3881_s14] sm:$0xff]  ;;  %s2984_s14 = smov 96   ;;  %v2871_v53 = vpack.c.bf16 %v1654_v52, %v1653_v51 }
 0xdee   :  { %v2835_v2 = vpack.c.bf16 %v1485_v0, %v1484_v57 }
 0xdef   :  { %2937 = vtanh.f32 %v1442_v55  ;;  %v2120_v58 = vmul.f32 -1.442695, %v1442_v55  ;;  %v1656_v55 = vld [vmem:[%s3883_s16 + $0x38] sm:$0xff] }
 0xdf0   :  { %2836 = vmatpush3.bf16.msra.mxu0 %v2835_v2 }
 0xdf1   :  { %2939 = vpow2.f32 %v2120_v58  ;;  %2837 = vmatprep.subr.bf16.mxu0 %v2980_v45 }
 0xdf4   :  { %2839 = vmatpush3.bf16.msra.mxu0 %v2838_v4 }
 0xdf5   :  { %2840 = vmatprep.subr.bf16.mxu0 %v2980_v45 }
 0xdf8   :  { %2842 = vmatpush3.bf16.msra.mxu0 %v2841_v7  ;;  %v1822_v7 = vld [vmem:[%s3885_s18] sm:$0xff] }
 0xdf9   :  { %v2938_v56 = vpop.eup %2937  ;;  %2843 = vmatprep.subr.bf16.mxu0 %v2980_v45  ;;  %v2877_v11 = vpack.c.bf16 %v1823_v9, %v1822_v7 }
 0xdfa   :  { %1455 = vrot.lane.b32.xlu0 %v2938_v56, %s2982_s22  ;;  %v2874_v56 = vpack.c.bf16 %v1656_v55, %v1655_v54 }
 0xdfb   :  { %v2940_v59 = vpop.eup %2939 }
 0xdfc   :  { %v1446_v60 = vadd.f32 1.0, %v2940_v59  ;;  %2845 = vmatpush3.bf16.msra.mxu0 %v2844_v12  ;;  %v1824_v12 = vld [vmem:[%s3885_s18 + $0x10] sm:$0xff] }
 0xdfd   :  { %2846 = vmatprep.subr.bf16.mxu0 %v2980_v45  ;;  %v2880_v14 = vpack.c.bf16 %v1825_v13, %v1824_v12 }
 0xdfe   :  { %2941 = vrcp.f32 %v1446_v60 }
 0xe00   :  { %2848 = vmatpush3.bf16.msra.mxu0 %v2847_v15  ;;  %v1826_v15 = vld [vmem:[%s3885_s18 + $0x20] sm:$0xff] }
 0xe01   :  { %2849 = vmatprep.subr.bf16.mxu0 %v2980_v45  ;;  %v2883_v17 = vpack.c.bf16 %v1827_v16, %v1826_v15 }
 0xe04   :  { %2851 = vmatpush3.bf16.msra.mxu0 %v2850_v18 }
 0xe05   :  { %2852 = vmatprep.subr.bf16.mxu0 %v2980_v45 }
 0xe08   :  { %v3678_v61 = vpop.eup %2941  ;;  %2854 = vmatpush3.bf16.msra.mxu0 %v2853_v21  ;;  %v1828_v21 = vld [vmem:[%s3885_s18 + $0x30] sm:$0xff] }
 0xe09   :  { %2855 = vmatprep.subr.bf16.mxu0 %v2980_v45  ;;  %v1453_v23 = vmul.f32 %v3678_v61, %v1451_v22  ;;  %v1829_v22 = vld [vmem:[%s3885_s18 + $0x38] sm:$0xff] }
 0xe0c   :  { %2857 = vmatpush3.bf16.msra.mxu0 %v2856_v28  ;;  %v2889_v28 = vpack.c.bf16 %v1905_v27, %v1904_v26 }
 0xe0d   :  { %2876 = vmatprep.subr.bf16.mxu0 %v2980_v45 }
 0xe6c   :  { %v1456_v62 = vpop.permute.xlu0 %1455 }
 0xe6d   :  { %v1458_v63 = vmul.f32 %v3678_v61, %v1456_v62 }
 0xe6f   :  { %1460 = vrot.lane.b32.xlu1 %v1458_v63, %s2983_s7 }
 0xe73   :  { %1471 = vrot.lane.b32.xlu1 %v1257_v29, %s2982_s22  ;;  %v1570_v29 = vld [vmem:[%s3882_s15] sm:$0xff] }
 0xe74   :  { %v2859_v32 = vpack.c.bf16 %v1571_v30, %v1570_v29 }
 0xe76   :  { %2860 = vmatpush3.bf16.msra.mxu1 %v2859_v32  ;;  %v1987_v32 = vld [vmem:[%s3877_s10] sm:$0xff] }
 0xe77   :  { %2861 = vmatprep.subr.bf16.mxu1 %v2980_v45 }
 0xe7a   :  { %2863 = vmatpush3.bf16.msra.mxu1 %v2862_v34 }
 0xe7b   :  { %2864 = vmatprep.subr.bf16.mxu1 %v2980_v45 }
 0xee1   :  { %v1461_v24 = vpop.permute.xlu1 %1460 }
 0xee2   :  { %v1463_v25 = vadd.f32 %v1461_v24, %v1453_v23 }
 0xee4   :  { %2943 = vtanh.f32 %v1463_v25 }
 0xee5   :  { %v1472_v37 = vpop.permute.xlu1 %1471 }
 0xee6   :  { %v1480_v40 = vsel %vm958_vm6, %v3642_v10, %v1472_v37  ;;  %v1651_v10 = vld [vmem:[%s3883_s16 + $0x10] sm:$0xff]  ;;  %s2085_s16 = sshll.u32 %s2985_s5, 4  ;;  %s2086_s16 = int_to_ptr.vmem [resolvable:$true] %s2085_s16 }
 0xee7   :  { %s2955_s13 = scalar_lea.vmem %s2086_s16, 32  ;;  %p2960_p1 = scmp.lt.s32.totalorder %s2086_s16, %s2086_s16 }
 0xee8   :  { %p2956_p0 = scmp.ne.s32.totalorder %s2086_s16, %s2955_s13  ;;  %p2961_p2 = scmp.lt.s32.totalorder %s2955_s13, %s2955_s13 }
 0xeea   :  { %p2962_p3 = por %p2961_p2, %p2960_p1 }
 0xeec   :  { %p2963_p4 = pnand %p2962_p3, %p2956_p0 }
 0xeee   :  { %v2944_v35 = vpop.eup %2943 }
 0xeef   :  { %1466 = vrot.lane.b32.xlu0 %v2944_v35, %s2982_s22 }
 0xef3   :  { %1474 = vrot.lane.b32.xlu0 %v1364_v50, %s2984_s14  ;;  %v2868_v50 = vpack.c.bf16 %v1652_v48, %v1651_v10 }
 0xf61   :  { %v1467_v36 = vpop.permute.xlu0 %1466 }
 0xf62   :  { %v1469_v38 = vmul.f32 %v3678_v61, %v1467_v36 }
 0xf64   :  { %v1478_v39 = vrot.slane %v1469_v38, 6 }
 0xf65   :  { %v1475_v41 = vpop.permute.xlu0 %1474 }
 0xf66   :  { %v1481_v42 = vsel %vm577_vm4, %v1480_v40, %v1475_v41  ;;  %1574 = vrot.lane.b32.xlu1 %v1478_v39, %s2983_s7 }
 0xf67   :  { %v1483_v43 = vsel %vm1482_vm7, %v1481_v42, %v1478_v39 }
 0xf68   :  { %2586 = vmatmul.mubr.f32.vlgmr.msra.gmra.mrb[34].mxu0 %v1483_v43 }
 0xf69   :  { %2639 = vmatprep.mubr.msk.f32.mxu0 %vm2981_vm0, %v2979_v8  ;;  %2878 = vmatpush3.bf16.msra.mxu0 %v2877_v11 }
 0xf6a   :  { %2879 = vmatprep.subr.bf16.mxu0 %v2980_v45 }
 0xf6d   :  { %2881 = vmatpush3.bf16.msra.mxu0 %v2880_v14 }
 0xf6e   :  { %2882 = vmatprep.subr.bf16.mxu0 %v2980_v45 }
 0xf71   :  { %2884 = vmatpush3.bf16.msra.mxu0 %v2883_v17 }
 0xf72   :  { %2885 = vmatprep.subr.bf16.mxu0 %v2980_v45 }
 0xfd8   :  { %v1575_v49 = vpop.permute.xlu1 %1574 }
 0xfd9   :  { %2597 = vmatmul.mubr.msk.f32.vlgmr.msra.gmra.mrb[26].mxu1 %vm958_vm6, %v1575_v49 }
 0xfda   :  { %2866 = vmatpush3.bf16.msra.mxu1 %v2865_v47  ;;  %2615 = vmatprep.mubr.msk.f32.mxu1 %vm2981_vm0, %v2979_v8 }
 0xfdb   :  { %2867 = vmatprep.subr.bf16.mxu1 %v2980_v45 }
 0xfde   :  { %2869 = vmatpush3.bf16.msra.mxu1 %v2868_v50 }
 0xfdf   :  { %2870 = vmatprep.subr.bf16.mxu1 %v2980_v45 }
 0xfe2   :  { %2872 = vmatpush3.bf16.msra.mxu1 %v2871_v53 }
 0xfe3   :  { %2873 = vmatprep.subr.bf16.mxu1 %v2980_v45 }
 0xfe6   :  { %2875 = vmatpush3.bf16.msra.mxu1 %v2874_v56 }
 0xfe7   :  { %2618 = vmatprep.subr.mxu1 %v2979_v8 }
0x103b   :  { %v1566_v58 = vpop.f32.mrb[34].mxu0 }
0x103c   :  { %v2587_v59 = vpop.f32.mrb[35].mxu0 }
0x10ac   :  { %v1644_v60 = vpop.f32.mrb[26].mxu1 }
0x10ad   :  { %v1648_v61 = vmul.f32 %v1644_v60, %v1566_v58  ;;  %v2598_v62 = vpop.f32.mrb[27].mxu1 }
0x10af   :  { %2616 = vmatmul.mubr.msk.f32.vlgmr.msra.gmra.mrb[28].mxu1 %vm577_vm4, %v1648_v61 }
0x10b0   :  { %2620 = vmatprep.mubr.msk.f32.mxu1 %vm2981_vm0, %v2979_v8  ;;  %2619 = vmatpush3.msk.msra.mxu1 %vm472_vm2, %v1743_v6 }
0x10b1   :  { %2888 = vmatprep.subr.bf16.mxu1 %v2980_v45  ;;  %v2886_v45 = vpack.c.bf16 %v1829_v22, %v1828_v21 }
0x10b3   :  { %2887 = vmatpush3.bf16.msra.mxu0 %v2886_v45 }
0x1182   :  { %v1726_v63 = vpop.f32.mrb[28].mxu1 }
0x1183   :  { %v2617_v57 = vpop.f32.mrb[29].mxu1  ;;  %v1731_v0 = vsel %vm1730_vm8, %v1726_v63, -inf }
0x1184   :  { %1732 = vmax.xlane.f32.xlu0 %v1731_v0 }
0x1211   :  { %v1733_v1 = vpop.xlane.xlu0 %1732 }
0x1212   :  { %v1734_v2 = vsub.f32 %v1726_v63, %v1733_v1 }
0x1214   :  { %v1735_v3 = vmul.f32 1.442695, %v1734_v2 }
0x1216   :  { %2945 = vpow2.f32 %v1735_v3 }
0x1220   :  { %v2946_v4 = vpop.eup %2945 }
0x1221   :  { %v1737_v5 = vsel %vm1730_vm8, %v2946_v4, 0.0 }
0x1222   :  { %1738 = vadd.xlane.f32.xlu1 %v1737_v5 }
0x12af   :  { %v1739_v18 = vpop.xlane.xlu1 %1738 }
0x12b0   :  { %2947 = vrcp.f32 %v1739_v18 }
0x12ba   :  { %v2948_v19 = vpop.eup %2947 }
0x12bb   :  { %v1741_v20 = vmul.f32 %v2948_v19, %v2946_v4 }
0x12bd   :  { %1742 = vst.msk [vmem:[#allocation5] sm:$0x3] %vm1730_vm8, %v1741_v20  ;;  %2621 = vmatmul.mubr.msk.f32.vlgmr.msra.gmra.mrb[30].mxu1 %vm1744_vm9, %v1741_v20 }
0x12be   :  { %2646 = vmatprep.mubr.msk.f32.mxu1 %vm2981_vm0, %v2979_v8  ;;  %2890 = vmatpush3.bf16.msra.mxu1 %v2889_v28 }
0x12bf   :  { %2649 = vmatprep.subr.mxu1 %v2979_v8 }
0x1390   :  { %v1817_v23 = vpop.f32.mrb[30].mxu1 }
0x1391   :  { %v1821_v24 = vmul.f32 %v1817_v23, %v1566_v58  ;;  %v2622_v25 = vpop.f32.mrb[31].mxu1 }
0x1393   :  { %2640 = vmatmul.mubr.msk.f32.vlgmr.msra.gmra.mrb[36].mxu0 %vm577_vm4, %v1821_v24 }
0x1466   :  { %v1899_v29 = vpop.f32.mrb[36].mxu0 }
0x1467   :  { %2949 = vtanh.f32 %v1899_v29  ;;  %v2641_v30 = vpop.f32.mrb[37].mxu0 }
0x1471   :  { %v2950_v31 = vpop.eup %2949 }
0x1472   :  { %2647 = vmatmul.mubr.msk.f32.vlgmr.msra.gmra.mrb[32].mxu1 %vm1913_vm10, %v2950_v31 }
0x1473   :  { %2651 = vmatprep.mubr.msk.f32.mxu1 %vm2981_vm0, %v2979_v8  ;;  %2650 = vmatpush3.msra.mxu1 %v1987_v32 }
0x1545   :  { %v1983_v34 = vpop.f32.mrb[32].mxu1 }
0x1546   :  { %v1984_v35 = vadd.f32 %v2126_v33, %v1983_v34  ;;  %v2648_v36 = vpop.f32.mrb[33].mxu1 }
0x1548   :  { %2652 = vmatmul.mubr.msk.f32.vlgmr.msra.gmra.mrb[34].mxu1 %vm1995_vm11, %v1984_v35 }
0x1549   :  { %2966 = shalt.err (!%p2963_p4)
}
0x154a   :  { %s2967_s24 = scalar_lea.hbm %s3887_s20, 32 }
0x154b   :  { %p2968_p5 = scmp.ne.s32.totalorder %s3887_s20, %s2967_s24  ;;  %p2971_p6 = scmp.lt.u32.totalorder %s2967_s24, %s3887_s20 }
0x154d   :  { %p2973_p7 = pnand %p2971_p6, %p2968_p5 }
0x154f   :  { %2976 = shalt.err (!%p2973_p7)
}
0x1550   :  { %2088 = dma.vmem_to_hbm [thread:$0]  %s2086_s16, 32, %s3887_s20, [#allocation6]   ;;  %v2128_v8 = vld [vmem:[#allocation4] ss:$0 sm:$0xff]  ;;  %vm2075_vm12 = vcmask 1024  }
0x161b   :  { %v2065_v37 = vpop.f32.mrb[34].mxu1 }
0x161c   :  { %v2066_v38 = vadd.f32 %v2128_v8, %v2065_v37  ;;  %v2653_v39 = vpop.f32.mrb[35].mxu1 }
0x161e   :  { %v2130_v40 = vmul.f32 -1.442695, %v2066_v38 }
0x1620   :  { %2951 = vpow2.f32 %v2130_v40 }
0x162a   :  { %v2952_v41 = vpop.eup %2951 }
0x162b   :  { %v2072_v42 = vadd.f32 1.0, %v2952_v41 }
0x162d   :  { %2953 = vrcp.f32 %v2072_v42 }
0x1637   :  { %v2954_v43 = vpop.eup %2953 }
0x1638   :  { %2076 = vst.msk [vmem:[%s3886_s19] sm:$0x3] %vm2075_vm12, %v2954_v43 }
0x1639   :  { %2977 = dma.done.wait [#allocation6], 32  }
0x163a   :  { %2978 = vsyncadd [#allocation6], 4294967264 }
0x163b   :  { %2094 = vsyncpa [#allocation6], 1 }

</bundles_post_ra>
